<compile_context>
chip_gen: v7x
topology: tpu7x:2x2x1
jax: 0.10.0
libtpu: 0.0.40
codegen_flags: <defaults>
</compile_context>

<pallas_src>
import functools

import numpy as np
import jax
import jax.numpy as jnp
from jax.experimental import pallas as pl
from jax.experimental.pallas import tpu as pltpu

NUM_FRAMES_TO_PREDICT = 2  # pose decoder predicts 2 frames x (axisangle, translation)


# ----------------------------- fused Pallas kernel ---------------------------


def _fused_pose_kernel(batch, x_ref, *refs):
    """Whole PoseResNet forward on VMEM-resident data.

    x_ref : (2*batch, Cin*H*W) bf16 -- rows 0..batch-1 = img1, rest = img2
    refs  : (w1,b1, w2,b2, w3,b3, wsq,bsq, wp0,bp0, wp1,bp1, wp2,bp2, out)
            w* are bf16 dense conv matrices (Cin*H*W, Cout*Ho*Wo),
            b* are f32 (1, Cout*Ho*Wo) biases.  The last matrix already has
            the global spatial mean folded in (width = 6*NUM_FRAMES).
    """
    o_ref = refs[-1]
    (w1, b1, w2, b2, w3, b3,
     wsq, bsq, wp0, bp0, wp1, bp1, wp2, bp2) = refs[:-1]

    def gemm(h, w_ref, b_ref, relu):
        # bf16 MXU matmul, f32 accumulation; bias + ReLU ride the VPU.
        acc = jnp.dot(h, w_ref[...], preferred_element_type=jnp.float32)
        acc = acc + b_ref[...]
        if relu:
            acc = jnp.maximum(acc, 0.0)
        return acc

    def bf16(a):
        return a.astype(jnp.bfloat16)

    # ---- shared encoder, both images batched together (2*batch rows) ----
    x = x_ref[...]
    f1 = bf16(gemm(x, w1, b1, True))      # conv1: 3 ->  8, stride 2
    f2 = bf16(gemm(f1, w2, b2, True))     # conv2: 8 -> 16, stride 2
    f3 = gemm(f2, w3, b3, True)           # conv3: 16 -> 32, stride 2  (f32)

    # ---- torch.cat([enc(img1)[-1], enc(img2)[-1]], dim=1) ----
    # channel-concat == lane-concat of the two images' flattened features.
    cat = bf16(jnp.concatenate([f3[:batch, :], f3[batch:, :]], axis=-1))

    # ---- pose decoder ----
    h = bf16(gemm(cat, wsq, bsq, True))   # squeeze 1x1: 64 -> 16
    h = bf16(gemm(h, wp0, bp0, True))     # pose conv 0: 3x3, 16 -> 16
    h = bf16(gemm(h, wp1, bp1, True))     # pose conv 1: 3x3, 16 -> 16
    pose = gemm(h, wp2, bp2, False)       # 1x1 head with folded spatial mean
    o_ref[...] = (0.01 * pose).astype(o_ref.dtype)


# ------------------- one-time conv -> dense-GEMM weight prep -----------------


def conv_to_dense(w, b, H, W, stride, pad):
    """Fold a PyTorch-semantics Conv2d into a dense matrix.

    Returns (M, bias, Ho, Wo) with
        conv(x).reshape(N, Cout*Ho*Wo) == x.reshape(N, Cin*H*W) @ M + bias
    for NCHW inputs flattened channel-major (same order as torch .reshape).
    Host-side numpy, runs once at weight-prep time -- never per forward.
    """
    w = np.asarray(w, dtype=np.float32)
    b = np.asarray(b, dtype=np.float32)
    cout, cin, kh, kw = w.shape
    Ho = (H + 2 * pad - kh) // stride + 1
    Wo = (W + 2 * pad - kw) // stride + 1
    dense = np.zeros((cin, H, W, cout, Ho, Wo), dtype=np.float32)
    for dy in range(kh):
        for dx in range(kw):
            tap = w[:, :, dy, dx].T                      # (cin, cout)
            for ho in range(Ho):
                iy = ho * stride + dy - pad
                if iy < 0 or iy >= H:
                    continue
                for wo in range(Wo):
                    ix = wo * stride + dx - pad
                    if ix < 0 or ix >= W:
                        continue
                    dense[:, iy, ix, :, ho, wo] += tap
    dense = dense.reshape(cin * H * W, cout * Ho * Wo)
    bias = np.repeat(b, Ho * Wo)                         # (cout*Ho*Wo,)
    return dense, bias, Ho, Wo


def prepare_pose_resnet(params, input_hw=(16, 16)):
    """One-time weight preprocessing (no activation data involved):
    conv -> dense bf16 GEMM matrices + f32 biases, global spatial mean of the
    pose head folded into the last matrix."""
    H, W = input_hw
    m1, c1, h1, w1 = conv_to_dense(*params["enc1"], H, W, 2, 1)
    m2, c2, h2, w2 = conv_to_dense(*params["enc2"], h1, w1, 2, 1)
    m3, c3, h3, w3 = conv_to_dense(*params["enc3"], h2, w2, 2, 1)
    msq, csq, hs, ws = conv_to_dense(*params["squeeze"], h3, w3, 1, 0)
    mp0, cp0, _, _ = conv_to_dense(*params["pose0"], hs, ws, 1, 1)
    mp1, cp1, _, _ = conv_to_dense(*params["pose1"], hs, ws, 1, 1)
    mp2, _, hp, wp = conv_to_dense(*params["pose2"], hs, ws, 1, 0)

    n_out = params["pose2"][0].shape[0]                  # 6 * NUM_FRAMES_TO_PREDICT
    mp2_mean = mp2.reshape(-1, n_out, hp * wp).mean(axis=2)   # fold out.mean(3).mean(2)
    cp2_mean = np.asarray(params["pose2"][1], np.float32)     # bias is spatially constant

    def w_(m):
        return jnp.asarray(m, jnp.bfloat16)

    def b_(v):
        return jnp.asarray(v, jnp.float32).reshape(1, -1)

    return (w_(m1), b_(c1), w_(m2), b_(c2), w_(m3), b_(c3),
            w_(msq), b_(csq), w_(mp0), b_(cp0), w_(mp1), b_(cp1),
            w_(mp2_mean), b_(cp2_mean))


# ------------------------------- forward pass ---------------------------------


def pose_resnet_forward(prepared, img1, img2):
    """PoseResNet.forward: one fused pallas_call.  Only metadata-level
    reshapes and the axisangle/translation split remain outside the kernel."""
    n = img1.shape[0]
    x = jnp.concatenate([img1, img2], axis=0)            # share encoder: batch both images
    x_flat = x.reshape(2 * n, -1).astype(jnp.bfloat16)   # channel-major flatten, bf16 MXU operand

    vmem = pl.BlockSpec(memory_space=pltpu.MemorySpace.VMEM)
    # NOTE: at real image resolutions, tile the encoder GEMMs over M with a
    # ("parallel",) grid instead of a single un-gridded VMEM-resident block.
    pose = pl.pallas_call(
        functools.partial(_fused_pose_kernel, n),
        out_shape=jax.ShapeDtypeStruct((n, 6 * NUM_FRAMES_TO_PREDICT), jnp.float32),
        in_specs=[vmem] * (1 + len(prepared)),
        out_specs=vmem,
    )(x_flat, *prepared)

    pose = pose.reshape(n, NUM_FRAMES_TO_PREDICT, 1, 6)
    axisangle = pose[..., :3]
    translation = pose[..., 3:]
    return axisangle, translation


# ------------------------------ model parameters ------------------------------


def init_params(key):
    def conv_init(key, cout, cin, kh, kw):
        kw_, kb_ = jax.random.split(key)
        w = 0.1 * jax.random.normal(kw_, (cout, cin, kh, kw), jnp.float32)
        b = 0.01 * jax.random.normal(kb_, (cout,), jnp.float32)
        return w, b

    keys = jax.random.split(key, 7)
    return {
        # encoder: 3 stride-2 3x3 convs producing a feature pyramid
        "enc1": conv_init(keys[0], 8, 3, 3, 3),
        "enc2": conv_init(keys[1], 16, 8, 3, 3),
        "enc3": conv_init(keys[2], 32, 16, 3, 3),
        # pose decoder (monodepth2-style): squeeze + 2x 3x3 + 1x1 head
        "squeeze": conv_init(keys[3], 16, 64, 1, 1),
        "pose0": conv_init(keys[4], 16, 16, 3, 3),
        "pose1": conv_init(keys[5], 16, 16, 3, 3),
        "pose2": conv_init(keys[6], 6 * NUM_FRAMES_TO_PREDICT, 16, 1, 1),
    }


# --------------------- plain-JAX reference (test only) ------------------------


def _conv_ref(x, w, b, stride, pad, relu):
    out = jax.lax.conv_general_dilated(
        x, w, window_strides=(stride, stride),
        padding=[(pad, pad), (pad, pad)],
        dimension_numbers=("NCHW", "OIHW", "NCHW"))
    out = out + b.reshape(1, -1, 1, 1)
    return jnp.maximum(out, 0.0) if relu else out


def pose_resnet_reference(params, img1, img2):
    def encoder(x):
        f1 = _conv_ref(x, *params["enc1"], 2, 1, True)
        f2 = _conv_ref(f1, *params["enc2"], 2, 1, True)
        f3 = _conv_ref(f2, *params["enc3"], 2, 1, True)
        return [f1, f2, f3]

    feats1, feats2 = encoder(img1), encoder(img2)
    cat = jnp.concatenate([feats1[-1], feats2[-1]], axis=1)
    out = _conv_ref(cat, *params["squeeze"], 1, 0, True)
    out = _conv_ref(out, *params["pose0"], 1, 1, True)
    out = _conv_ref(out, *params["pose1"], 1, 1, True)
    out = _conv_ref(out, *params["pose2"], 1, 0, False)
    mean = out.mean(axis=(2, 3))
    pose = 0.01 * mean.reshape(-1, NUM_FRAMES_TO_PREDICT, 1, 6)
    return pose[..., :3], pose[..., 3:]


# ----------------------------------- main --------------------------------------

if __name__ == "__main__":
    key = jax.random.PRNGKey(0)
    kp, k1, k2 = jax.random.split(key, 3)
    params = init_params(kp)

    # small inputs: batch=2, channels=3 (RGB), spatial=16x16, NCHW
    img1 = jax.random.normal(k1, (2, 3, 16, 16), jnp.float32)
    img2 = jax.random.normal(k2, (2, 3, 16, 16), jnp.float32)

    prepared = prepare_pose_resnet(params, input_hw=(16, 16))   # one-time weight repack

    fwd = jax.jit(pose_resnet_forward)
    axisangle, translation = fwd(prepared, img1, img2)
    jax.block_until_ready((axisangle, translation))

    assert axisangle.shape == (2, NUM_FRAMES_TO_PREDICT, 1, 3)
    assert translation.shape == (2, NUM_FRAMES_TO_PREDICT, 1, 3)

    # correctness vs. a plain-JAX f32 reference of the original PyTorch graph
    # (loose tolerance: the kernel uses bf16 MXU operands with f32 accumulation)
    aa_ref, tr_ref = pose_resnet_reference(params, img1, img2)
    np.testing.assert_allclose(np.asarray(axisangle), np.asarray(aa_ref),
                               rtol=1e-1, atol=1e-4)
    np.testing.assert_allclose(np.asarray(translation), np.asarray(tr_ref),
                               rtol=1e-1, atol=1e-4)

    print("KERNEL_OK")
</pallas_src>

<mosaic_0001>
module attributes {stable_mosaic.version = 11 : i64} {
  func.func @_fused_pose_kernel(%arg0: memref<4x768xbf16, #tpu.memory_space<vmem>>, %arg1: memref<768x512xbf16, #tpu.memory_space<vmem>>, %arg2: memref<1x512xf32, #tpu.memory_space<vmem>>, %arg3: memref<512x256xbf16, #tpu.memory_space<vmem>>, %arg4: memref<1x256xf32, #tpu.memory_space<vmem>>, %arg5: memref<256x128xbf16, #tpu.memory_space<vmem>>, %arg6: memref<1x128xf32, #tpu.memory_space<vmem>>, %arg7: memref<256x64xbf16, #tpu.memory_space<vmem>>, %arg8: memref<1x64xf32, #tpu.memory_space<vmem>>, %arg9: memref<64x64xbf16, #tpu.memory_space<vmem>>, %arg10: memref<1x64xf32, #tpu.memory_space<vmem>>, %arg11: memref<64x64xbf16, #tpu.memory_space<vmem>>, %arg12: memref<1x64xf32, #tpu.memory_space<vmem>>, %arg13: memref<64x12xbf16, #tpu.memory_space<vmem>>, %arg14: memref<1x12xf32, #tpu.memory_space<vmem>>, %arg15: memref<2x12xf32, #tpu.memory_space<vmem>>) attributes {dimension_semantics = [], scalar_prefetch = 0 : i64, scratch_operands = 0 : i64, tpu.core_type = #tpu.core_type<tc>} {
    %c0 = arith.constant 0 : index
    %c0_0 = arith.constant 0 : index
    %0 = vector.load %arg0[%c0, %c0_0] : memref<4x768xbf16, #tpu.memory_space<vmem>>, vector<4x768xbf16>
    %c0_1 = arith.constant 0 : index
    %c0_2 = arith.constant 0 : index
    %1 = vector.load %arg1[%c0_1, %c0_2] : memref<768x512xbf16, #tpu.memory_space<vmem>>, vector<768x512xbf16>
    %cst = arith.constant dense<0.000000e+00> : vector<4x512xf32>
    %2 = tpu.matmul %0, %1, %cst {dimension_numbers = #tpu.dot_dimension_numbers<[1], [0], [0], [1], [0, 0, 1, 1], [], []>} : vector<4x768xbf16>, vector<768x512xbf16>, vector<4x512xf32> -> vector<4x512xf32>
    %c0_3 = arith.constant 0 : index
    %c0_4 = arith.constant 0 : index
    %3 = vector.load %arg2[%c0_3, %c0_4] : memref<1x512xf32, #tpu.memory_space<vmem>>, vector<1x512xf32>
    %4 = vector.broadcast %3 : vector<1x512xf32> to vector<4x512xf32>
    %5 = arith.addf %2, %4 : vector<4x512xf32>
    %cst_5 = arith.constant 0.000000e+00 : f32
    %6 = vector.broadcast %cst_5 : f32 to vector<4x512xf32>
    %7 = arith.maximumf %5, %6 : vector<4x512xf32>
    %8 = arith.truncf %7 : vector<4x512xf32> to vector<4x512xbf16>
    %c0_6 = arith.constant 0 : index
    %c0_7 = arith.constant 0 : index
    %9 = vector.load %arg3[%c0_6, %c0_7] : memref<512x256xbf16, #tpu.memory_space<vmem>>, vector<512x256xbf16>
    %cst_8 = arith.constant dense<0.000000e+00> : vector<4x256xf32>
    %10 = tpu.matmul %8, %9, %cst_8 {dimension_numbers = #tpu.dot_dimension_numbers<[1], [0], [0], [1], [0, 0, 1, 1], [], []>} : vector<4x512xbf16>, vector<512x256xbf16>, vector<4x256xf32> -> vector<4x256xf32>
    %c0_9 = arith.constant 0 : index
    %c0_10 = arith.constant 0 : index
    %11 = vector.load %arg4[%c0_9, %c0_10] : memref<1x256xf32, #tpu.memory_space<vmem>>, vector<1x256xf32>
    %12 = vector.broadcast %11 : vector<1x256xf32> to vector<4x256xf32>
    %13 = arith.addf %10, %12 : vector<4x256xf32>
    %cst_11 = arith.constant 0.000000e+00 : f32
    %14 = vector.broadcast %cst_11 : f32 to vector<4x256xf32>
    %15 = arith.maximumf %13, %14 : vector<4x256xf32>
    %16 = arith.truncf %15 : vector<4x256xf32> to vector<4x256xbf16>
    %c0_12 = arith.constant 0 : index
    %c0_13 = arith.constant 0 : index
    %17 = vector.load %arg5[%c0_12, %c0_13] : memref<256x128xbf16, #tpu.memory_space<vmem>>, vector<256x128xbf16>
    %cst_14 = arith.constant dense<0.000000e+00> : vector<4x128xf32>
    %18 = tpu.matmul %16, %17, %cst_14 {dimension_numbers = #tpu.dot_dimension_numbers<[1], [0], [0], [1], [0, 0, 1, 1], [], []>} : vector<4x256xbf16>, vector<256x128xbf16>, vector<4x128xf32> -> vector<4x128xf32>
    %c0_15 = arith.constant 0 : index
    %c0_16 = arith.constant 0 : index
    %19 = vector.load %arg6[%c0_15, %c0_16] : memref<1x128xf32, #tpu.memory_space<vmem>>, vector<1x128xf32>
    %20 = vector.broadcast %19 : vector<1x128xf32> to vector<4x128xf32>
    %21 = arith.addf %18, %20 : vector<4x128xf32>
    %cst_17 = arith.constant 0.000000e+00 : f32
    %22 = vector.broadcast %cst_17 : f32 to vector<4x128xf32>
    %23 = arith.maximumf %21, %22 : vector<4x128xf32>
    %24 = vector.extract_strided_slice %23 {offsets = [0, 0], sizes = [2, 128], strides = [1, 1]} : vector<4x128xf32> to vector<2x128xf32>
    %25 = vector.extract_strided_slice %23 {offsets = [2, 0], sizes = [2, 128], strides = [1, 1]} : vector<4x128xf32> to vector<2x128xf32>
    %26 = tpu.concatenate %24, %25 in 1 : vector<2x128xf32>, vector<2x128xf32> -> vector<2x256xf32>
    %27 = arith.truncf %26 : vector<2x256xf32> to vector<2x256xbf16>
    %c0_18 = arith.constant 0 : index
    %c0_19 = arith.constant 0 : index
    %28 = vector.load %arg7[%c0_18, %c0_19] : memref<256x64xbf16, #tpu.memory_space<vmem>>, vector<256x64xbf16>
    %cst_20 = arith.constant dense<0.000000e+00> : vector<2x64xf32>
    %29 = tpu.matmul %27, %28, %cst_20 {dimension_numbers = #tpu.dot_dimension_numbers<[1], [0], [0], [1], [0, 0, 1, 1], [], []>} : vector<2x256xbf16>, vector<256x64xbf16>, vector<2x64xf32> -> vector<2x64xf32>
    %c0_21 = arith.constant 0 : index
    %c0_22 = arith.constant 0 : index
    %30 = vector.load %arg8[%c0_21, %c0_22] : memref<1x64xf32, #tpu.memory_space<vmem>>, vector<1x64xf32>
    %31 = vector.broadcast %30 : vector<1x64xf32> to vector<2x64xf32>
    %32 = arith.addf %29, %31 : vector<2x64xf32>
    %cst_23 = arith.constant 0.000000e+00 : f32
    %33 = vector.broadcast %cst_23 : f32 to vector<2x64xf32>
    %34 = arith.maximumf %32, %33 : vector<2x64xf32>
    %35 = arith.truncf %34 : vector<2x64xf32> to vector<2x64xbf16>
    %c0_24 = arith.constant 0 : index
    %c0_25 = arith.constant 0 : index
    %36 = vector.load %arg9[%c0_24, %c0_25] : memref<64x64xbf16, #tpu.memory_space<vmem>>, vector<64x64xbf16>
    %cst_26 = arith.constant dense<0.000000e+00> : vector<2x64xf32>
    %37 = tpu.matmul %35, %36, %cst_26 {dimension_numbers = #tpu.dot_dimension_numbers<[1], [0], [0], [1], [0, 0, 1, 1], [], []>} : vector<2x64xbf16>, vector<64x64xbf16>, vector<2x64xf32> -> vector<2x64xf32>
    %c0_27 = arith.constant 0 : index
    %c0_28 = arith.constant 0 : index
    %38 = vector.load %arg10[%c0_27, %c0_28] : memref<1x64xf32, #tpu.memory_space<vmem>>, vector<1x64xf32>
    %39 = vector.broadcast %38 : vector<1x64xf32> to vector<2x64xf32>
    %40 = arith.addf %37, %39 : vector<2x64xf32>
    %cst_29 = arith.constant 0.000000e+00 : f32
    %41 = vector.broadcast %cst_29 : f32 to vector<2x64xf32>
    %42 = arith.maximumf %40, %41 : vector<2x64xf32>
    %43 = arith.truncf %42 : vector<2x64xf32> to vector<2x64xbf16>
    %c0_30 = arith.constant 0 : index
    %c0_31 = arith.constant 0 : index
    %44 = vector.load %arg11[%c0_30, %c0_31] : memref<64x64xbf16, #tpu.memory_space<vmem>>, vector<64x64xbf16>
    %cst_32 = arith.constant dense<0.000000e+00> : vector<2x64xf32>
    %45 = tpu.matmul %43, %44, %cst_32 {dimension_numbers = #tpu.dot_dimension_numbers<[1], [0], [0], [1], [0, 0, 1, 1], [], []>} : vector<2x64xbf16>, vector<64x64xbf16>, vector<2x64xf32> -> vector<2x64xf32>
    %c0_33 = arith.constant 0 : index
    %c0_34 = arith.constant 0 : index
    %46 = vector.load %arg12[%c0_33, %c0_34] : memref<1x64xf32, #tpu.memory_space<vmem>>, vector<1x64xf32>
    %47 = vector.broadcast %46 : vector<1x64xf32> to vector<2x64xf32>
    %48 = arith.addf %45, %47 : vector<2x64xf32>
    %cst_35 = arith.constant 0.000000e+00 : f32
    %49 = vector.broadcast %cst_35 : f32 to vector<2x64xf32>
    %50 = arith.maximumf %48, %49 : vector<2x64xf32>
    %51 = arith.truncf %50 : vector<2x64xf32> to vector<2x64xbf16>
    %c0_36 = arith.constant 0 : index
    %c0_37 = arith.constant 0 : index
    %52 = vector.load %arg13[%c0_36, %c0_37] : memref<64x12xbf16, #tpu.memory_space<vmem>>, vector<64x12xbf16>
    %cst_38 = arith.constant dense<0.000000e+00> : vector<2x12xf32>
    %53 = tpu.matmul %51, %52, %cst_38 {dimension_numbers = #tpu.dot_dimension_numbers<[1], [0], [0], [1], [0, 0, 1, 1], [], []>} : vector<2x64xbf16>, vector<64x12xbf16>, vector<2x12xf32> -> vector<2x12xf32>
    %c0_39 = arith.constant 0 : index
    %c0_40 = arith.constant 0 : index
    %54 = vector.load %arg14[%c0_39, %c0_40] : memref<1x12xf32, #tpu.memory_space<vmem>>, vector<1x12xf32>
    %55 = vector.broadcast %54 : vector<1x12xf32> to vector<2x12xf32>
    %56 = arith.addf %53, %55 : vector<2x12xf32>
    %cst_41 = arith.constant 0.00999999977 : f32
    %57 = vector.broadcast %cst_41 : f32 to vector<2x12xf32>
    %58 = arith.mulf %57, %56 : vector<2x12xf32>
    %c0_42 = arith.constant 0 : index
    %c0_43 = arith.constant 0 : index
    %59 = vector.load %arg15[%c0_42, %c0_43] : memref<2x12xf32, #tpu.memory_space<vmem>>, vector<2x12xf32>
    tpu.vector_store %arg15[%c0_42, %c0_43], %58 {strides = array<i32>} : memref<2x12xf32, #tpu.memory_space<vmem>>, vector<2x12xf32>,
    return
  }
}

</mosaic_0001>

<bundles_post_ra>
// kernel: pose_resnet_forward.1
= control target key start
LH: loop header
LB: loop body
LE: loop exit
PB: predicated region body
PF: predicated region fallthrough
CT: control target
= control target key end

     0   :  { %20 = vsyncpa [#allocation3], 0  ;;  %s4257_s0 = inlined_call_operand.vmem [shape: bf16[4,768], index: 0, kind: input, shape index: {}]   ;;  %s4258_s1 = inlined_call_operand.hbm [shape: bf16[768,512], index: 1, kind: input, shape index: {}]   ;;  %s4259_s2 = inlined_call_operand.vmem [shape: f32[1,512], index: 2, kind: input, shape index: {}]   ;;  %s4260_s3 = inlined_call_operand.vmem [shape: bf16[512,256], index: 3, kind: input, shape index: {}]   ;;  %s4261_s4 = inlined_call_operand.hbm [shape: f32[1,256], index: 4, kind: input, shape index: {}]   ;;  %s4262_s5 = inlined_call_operand.vmem [shape: bf16[256,128], index: 5, kind: input, shape index: {}]   ;;  %s4263_s6 = inlined_call_operand.vmem [shape: f32[1,128], index: 6, kind: input, shape index: {}]   ;;  %s4264_s7 = inlined_call_operand.vmem [shape: bf16[256,64], index: 7, kind: input, shape index: {}]   ;;  %s4265_s8 = inlined_call_operand.hbm [shape: f32[1,64], index: 8, kind: input, shape index: {}]   ;;  %s4266_s9 = inlined_call_operand.vmem [shape: bf16[64,64], index: 9, kind: input, shape index: {}]   ;;  %s4267_s10 = inlined_call_operand.hbm [shape: f32[1,64], index: 10, kind: input, shape index: {}]   ;;  %s4268_s11 = inlined_call_operand.vmem [shape: bf16[64,64], index: 11, kind: input, shape index: {}]   ;;  %s4269_s12 = inlined_call_operand.hbm [shape: f32[1,64], index: 12, kind: input, shape index: {}]   ;;  %s4270_s13 = inlined_call_operand.vmem [shape: bf16[64,12], index: 13, kind: input, shape index: {}]   ;;  %s4271_s14 = inlined_call_operand.hbm [shape: f32[1,12], index: 14, kind: input, shape index: {}]   ;;  %s4272_s15 = inlined_call_operand.vmem [shape: f32[2,12], index: 15, kind: output, shape index: {}]  }
   0x1   :  { %21 = vsyncpa [#allocation5], 0 }
   0x2   :  { %22 = vsyncpa [#allocation8], 0 }
   0x3   :  { %23 = vsyncpa [#allocation11], 0  ;;  %s3698_s18 = smov [#allocation4]   ;;  %s3699_s20 = smov [#allocation7]  }
   0x4   :  { %s48_s19 = sshll.u32 %s3698_s18, 4  ;;  %s76_s21 = sshll.u32 %s3699_s20, 4  ;;  %s49_s19 = int_to_ptr.vmem [resolvable:$true] %s48_s19  ;;  %s77_s21 = int_to_ptr.vmem [resolvable:$true] %s76_s21 }
   0x5   :  { %s3558_s24 = scalar_lea.hbm %s4261_s4, 32 }
   0x6   :  { %p3559_p0 = scmp.ne.s32.totalorder %s4261_s4, %s3558_s24  ;;  %p3562_p1 = scmp.lt.u32.totalorder %s3558_s24, %s4261_s4 }
   0x8   :  { %p3564_p2 = pnand %p3562_p1, %p3559_p0 }
   0xa   :  { %3567 = shalt.err (!%p3564_p2)
}
   0xb   :  { %s3568_s29 = scalar_lea.vmem %s49_s19, 32  ;;  %p3573_p4 = scmp.lt.s32.totalorder %s49_s19, %s49_s19 }
   0xc   :  { %p3569_p3 = scmp.ne.s32.totalorder %s49_s19, %s3568_s29  ;;  %p3574_p5 = scmp.lt.s32.totalorder %s3568_s29, %s3568_s29 }
   0xe   :  { %p3575_p6 = por %p3574_p5, %p3573_p4 }
  0x10   :  { %p3576_p7 = pnand %p3575_p6, %p3569_p3 }
  0x12   :  { %3579 = shalt.err (!%p3576_p7)
}
  0x13   :  { %51 = dma.hbm_to_vmem [thread:$0]  %s4261_s4, 32, %s49_s19, [#allocation5]  }
  0x14   :  { %s3580_s20 = scalar_lea.hbm %s4267_s10, 16 }
  0x15   :  { %p3581_p8 = scmp.ne.s32.totalorder %s4267_s10, %s3580_s20  ;;  %p3584_p9 = scmp.lt.u32.totalorder %s3580_s20, %s4267_s10 }
  0x17   :  { %p3586_p10 = pnand %p3584_p9, %p3581_p8 }
  0x19   :  { %3589 = shalt.err (!%p3586_p10)
}
  0x1a   :  { %s3590_s26 = scalar_lea.vmem %s77_s21, 16  ;;  %s3594_s27 = scalar_lea.vmem %s77_s21, 32 }
  0x1b   :  { %p3591_p11 = scmp.ne.s32.totalorder %s77_s21, %s3590_s26  ;;  %p3595_p12 = scmp.lt.s32.totalorder %s77_s21, %s77_s21 }
  0x1c   :  { %p3596_p13 = scmp.lt.s32.totalorder %s3594_s27, %s3590_s26 }
  0x1e   :  { %p3597_p0 = por %p3596_p13, %p3595_p12 }
  0x20   :  { %p3598_p1 = pnand %p3597_p0, %p3591_p11 }
  0x22   :  { %3601 = shalt.err (!%p3598_p1)
}
  0x23   :  { %79 = dma.hbm_to_vmem [thread:$0]  %s4267_s10, 16, %s77_s21, [#allocation8]  }
  0x24   :  { %s3700_s28 = smov [#allocation2]   ;;  %s3602_s17 = scalar_lea.hbm %s4258_s1, 24576 }
  0x25   :  { %s31_s29 = sshll.u32 %s3700_s28, 4  ;;  %p3603_p2 = scmp.ne.s32.totalorder %s4258_s1, %s3602_s17  ;;  %s32_s29 = int_to_ptr.vmem [resolvable:$true] %s31_s29 }
  0x26   :  { %p3606_p3 = scmp.lt.u32.totalorder %s3602_s17, %s4258_s1 }
  0x28   :  { %p3608_p4 = pnand %p3606_p3, %p3603_p2 }
  0x2a   :  { %3611 = shalt.err (!%p3608_p4)
}
  0x2b   :  { %s3612_s24 = scalar_lea.vmem %s32_s29, 24576  ;;  %p3617_p6 = scmp.lt.s32.totalorder %s32_s29, %s32_s29 }
  0x2c   :  { %p3613_p5 = scmp.ne.s32.totalorder %s32_s29, %s3612_s24  ;;  %p3618_p7 = scmp.lt.s32.totalorder %s3612_s24, %s3612_s24 }
  0x2e   :  { %p3619_p8 = por %p3618_p7, %p3617_p6 }
  0x30   :  { %p3620_p9 = pnand %p3619_p8, %p3613_p5 }
  0x32   :  { %3623 = shalt.err (!%p3620_p9)
}
  0x33   :  { %s3701_s10 = smov 256   ;;  %s3702_s21 = smov 16  }
  0x34   :  { %37 = dma.hbm_to_vmem [thread:$0]  %s4258_s1, 24576, %s32_s29, [#allocation3], %s3701_s10, %s3701_s10, %s3702_s21  }
  0x35   :  { %s3703_s27 = smov [#allocation6]   ;;  %s3704_s19 = smov [#allocation9]  }
  0x36   :  { %s64_s4 = sshll.u32 %s3703_s27, 4  ;;  %s88_s28 = sshll.u32 %s3704_s19, 4  ;;  %s65_s4 = int_to_ptr.vmem [resolvable:$true] %s64_s4  ;;  %s89_s28 = int_to_ptr.vmem [resolvable:$true] %s88_s28 }
  0x37   :  { %s3624_s17 = scalar_lea.hbm %s4265_s8, 16 }
  0x38   :  { %p3625_p10 = scmp.ne.s32.totalorder %s4265_s8, %s3624_s17  ;;  %p3628_p11 = scmp.lt.u32.totalorder %s3624_s17, %s4265_s8 }
  0x3a   :  { %p3630_p12 = pnand %p3628_p11, %p3625_p10 }
  0x3c   :  { %3633 = shalt.err (!%p3630_p12)
}
  0x3d   :  { %s3634_s1 = scalar_lea.vmem %s65_s4, 16  ;;  %s3638_s29 = scalar_lea.vmem %s65_s4, 32 }
  0x3e   :  { %p3635_p13 = scmp.ne.s32.totalorder %s65_s4, %s3634_s1  ;;  %p3639_p0 = scmp.lt.s32.totalorder %s65_s4, %s65_s4 }
  0x3f   :  { %p3640_p1 = scmp.lt.s32.totalorder %s3638_s29, %s3634_s1 }
  0x41   :  { %p3641_p2 = por %p3640_p1, %p3639_p0 }
  0x43   :  { %p3642_p3 = pnand %p3641_p2, %p3635_p13 }
  0x45   :  { %3645 = shalt.err (!%p3642_p3)
}
  0x46   :  { %67 = dma.hbm_to_vmem [thread:$0]  %s4265_s8, 16, %s65_s4, [#allocation5]  }
  0x47   :  { %s3646_s26 = scalar_lea.hbm %s4269_s12, 16 }
  0x48   :  { %p3647_p4 = scmp.ne.s32.totalorder %s4269_s12, %s3646_s26  ;;  %p3650_p5 = scmp.lt.u32.totalorder %s3646_s26, %s4269_s12 }
  0x4a   :  { %p3652_p6 = pnand %p3650_p5, %p3647_p4 }
  0x4c   :  { %3655 = shalt.err (!%p3652_p6)
}
  0x4d   :  { %s3656_s17 = scalar_lea.vmem %s89_s28, 16  ;;  %s3660_s18 = scalar_lea.vmem %s89_s28, 32 }
  0x4e   :  { %p3657_p7 = scmp.ne.s32.totalorder %s89_s28, %s3656_s17  ;;  %p3661_p8 = scmp.lt.s32.totalorder %s89_s28, %s89_s28 }
  0x4f   :  { %p3662_p9 = scmp.lt.s32.totalorder %s3660_s18, %s3656_s17 }
  0x51   :  { %p3663_p10 = por %p3662_p9, %p3661_p8 }
  0x53   :  { %p3664_p11 = pnand %p3663_p10, %p3657_p7 }
  0x55   :  { %3667 = shalt.err (!%p3664_p11)
}
  0x56   :  { %91 = dma.hbm_to_vmem [thread:$0]  %s4269_s12, 16, %s89_s28, [#allocation8]  }
  0x57   :  { %s3705_s20 = smov [#allocation10]   ;;  %s3668_s29 = scalar_lea.hbm %s4271_s14, 16 }
  0x58   :  { %s100_s22 = sshll.u32 %s3705_s20, 4  ;;  %p3669_p12 = scmp.ne.s32.totalorder %s4271_s14, %s3668_s29  ;;  %s101_s22 = int_to_ptr.vmem [resolvable:$true] %s100_s22 }
  0x59   :  { %p3672_p13 = scmp.lt.u32.totalorder %s3668_s29, %s4271_s14 }
  0x5b   :  { %p3674_p0 = pnand %p3672_p13, %p3669_p12 }
  0x5d   :  { %3677 = shalt.err (!%p3674_p0)
}
  0x5e   :  { %s3678_s26 = scalar_lea.vmem %s101_s22, 16  ;;  %s3682_s12 = scalar_lea.vmem %s101_s22, 32 }
  0x5f   :  { %p3679_p1 = scmp.ne.s32.totalorder %s101_s22, %s3678_s26  ;;  %p3683_p2 = scmp.lt.s32.totalorder %s101_s22, %s101_s22 }
  0x60   :  { %p3684_p3 = scmp.lt.s32.totalorder %s3682_s12, %s3678_s26 }
  0x62   :  { %p3685_p4 = por %p3684_p3, %p3683_p2 }
  0x64   :  { %p3686_p5 = pnand %p3685_p4, %p3679_p1 }
  0x66   :  { %3689 = shalt.err (!%p3686_p5)
}
  0x67   :  { %103 = dma.hbm_to_vmem [thread:$0]  %s4271_s14, 16, %s101_s22, [#allocation11]  }
  0x68   :  { %3690 = dma.done.wait [#allocation3], 24576  }
  0x69   :  { %3691 = vsyncadd [#allocation3], 4294942720 }
  0x6a   :  { %3692 = dma.done.wait [#allocation5], 48  }
  0x6b   :  { %3693 = vsyncadd [#allocation5], 4294967248 }
  0x6c   :  { %3694 = dma.done.wait [#allocation8], 32  }
  0x6d   :  { %3695 = vsyncadd [#allocation8], 4294967264 }
  0x6e   :  { %3696 = dma.done.wait [#allocation11], 16  }
  0x6f   :  { %3697 = vsyncadd [#allocation11], 4294967280  ;;  %v3129_v0 = vld [vmem:[#allocation2 + $0x4] ss:$16 sps:$4 sm:$0xff]   ;;  %v3131_v1 = vld [vmem:[#allocation2 + $0xc] ss:$16 sps:$4 sm:$0xff]   ;;  %v319_v36 = vlaneseq }
  0x70   :  { %1332 = vmatprep.subr.bf16.mxu0 %v3129_v0  ;;  %v3133_v2 = vld [vmem:[#allocation2] ss:$16 sps:$4 sm:$0xff]   ;;  %v3134_v3 = vld [vmem:[#allocation2 + $0x8] ss:$16 sps:$4 sm:$0xff]   ;;  %1455 = vmatprep.subr.bf16.mxu1 %v3131_v1  ;;  %v3135_v4 = vld [vmem:[#allocation2 + $0x24] ss:$16 sps:$4 sm:$0xff]  }
  0x71   :  { %1333 = vmatpush1.bf16.msra.mxu0 %v3133_v2  ;;  %1456 = vmatpush1.bf16.msra.mxu1 %v3134_v3  ;;  %v3137_v5 = vld [vmem:[#allocation2 + $0x2c] ss:$16 sps:$4 sm:$0xff]   ;;  %v3139_v6 = vld [vmem:[#allocation2 + $0x20] ss:$16 sps:$4 sm:$0xff]   ;;  %v3140_v7 = vld [vmem:[#allocation2 + $0x28] ss:$16 sps:$4 sm:$0xff]  }
  0x72   :  { %1334 = vmatprep.subr.bf16.mxu0 %v3135_v4  ;;  %1457 = vmatprep.subr.bf16.mxu1 %v3137_v5  ;;  %v3141_v8 = vld [vmem:[#allocation2 + $0x44] ss:$16 sps:$4 sm:$0xff]   ;;  %v3143_v9 = vld [vmem:[#allocation2 + $0x4c] ss:$16 sps:$4 sm:$0xff]   ;;  %v3145_v10 = vld [vmem:[#allocation2 + $0x40] ss:$16 sps:$4 sm:$0xff]  }
  0x73   :  { %v3146_v11 = vld [vmem:[#allocation2 + $0x48] ss:$16 sps:$4 sm:$0xff]   ;;  %v3147_v12 = vld [vmem:[#allocation2 + $0x64] ss:$16 sps:$4 sm:$0xff]   ;;  %v3149_v13 = vld [vmem:[#allocation2 + $0x6c] ss:$16 sps:$4 sm:$0xff]  }
  0x74   :  { %v3151_v14 = vld [vmem:[#allocation2 + $0x60] ss:$16 sps:$4 sm:$0xff]   ;;  %v3152_v15 = vld [vmem:[#allocation2 + $0x68] ss:$16 sps:$4 sm:$0xff]   ;;  %v3153_v16 = vld [vmem:[#allocation2 + $0x84] ss:$16 sps:$4 sm:$0xff]  }
  0x75   :  { %1335 = vmatpush1.bf16.msra.mxu0 %v3139_v6  ;;  %1458 = vmatpush1.bf16.msra.mxu1 %v3140_v7  ;;  %v3155_v17 = vld [vmem:[#allocation2 + $0x8c] ss:$16 sps:$4 sm:$0xff]   ;;  %v3157_v18 = vld [vmem:[#allocation2 + $0x80] ss:$16 sps:$4 sm:$0xff]   ;;  %v3158_v19 = vld [vmem:[#allocation2 + $0x88] ss:$16 sps:$4 sm:$0xff]  }
  0x76   :  { %1336 = vmatprep.subr.bf16.mxu0 %v3141_v8  ;;  %1459 = vmatprep.subr.bf16.mxu1 %v3143_v9  ;;  %v3159_v20 = vld [vmem:[#allocation2 + $0xa4] ss:$16 sps:$4 sm:$0xff]   ;;  %v3161_v21 = vld [vmem:[#allocation2 + $0xac] ss:$16 sps:$4 sm:$0xff]   ;;  %v3163_v22 = vld [vmem:[#allocation2 + $0xa0] ss:$16 sps:$4 sm:$0xff]  }
  0x77   :  { %v3164_v23 = vld [vmem:[#allocation2 + $0xa8] ss:$16 sps:$4 sm:$0xff]   ;;  %v3165_v24 = vld [vmem:[#allocation2 + $0xc4] ss:$16 sps:$4 sm:$0xff]   ;;  %v3167_v25 = vld [vmem:[#allocation2 + $0xcc] ss:$16 sps:$4 sm:$0xff]  }
  0x78   :  { %v3169_v26 = vld [vmem:[#allocation2 + $0xc0] ss:$16 sps:$4 sm:$0xff]   ;;  %v3170_v27 = vld [vmem:[#allocation2 + $0xc8] ss:$16 sps:$4 sm:$0xff]   ;;  %v3171_v28 = vld [vmem:[#allocation2 + $0xe4] ss:$16 sps:$4 sm:$0xff]  }
  0x79   :  { %1337 = vmatpush1.bf16.msra.mxu0 %v3145_v10  ;;  %1460 = vmatpush1.bf16.msra.mxu1 %v3146_v11  ;;  %v3173_v29 = vld [vmem:[#allocation2 + $0xec] ss:$16 sps:$4 sm:$0xff]   ;;  %v3175_v30 = vld [vmem:[#allocation2 + $0xe0] ss:$16 sps:$4 sm:$0xff]   ;;  %v3176_v31 = vld [vmem:[#allocation2 + $0xe8] ss:$16 sps:$4 sm:$0xff]  }
  0x7a   :  { %1338 = vmatprep.subr.bf16.mxu0 %v3147_v12  ;;  %1461 = vmatprep.subr.bf16.mxu1 %v3149_v13  ;;  %v3177_v32 = vld [vmem:[#allocation2 + $0x104] ss:$16 sps:$4 sm:$0xff]   ;;  %v3179_v33 = vld [vmem:[#allocation2 + $0x10c] ss:$16 sps:$4 sm:$0xff]   ;;  %v3181_v34 = vld [vmem:[#allocation2 + $0x100] ss:$16 sps:$4 sm:$0xff]  }
  0x7b   :  { %v3182_v35 = vld [vmem:[#allocation2 + $0x108] ss:$16 sps:$4 sm:$0xff]   ;;  %v3706_v37 = vmov 1983009808   ;;  %v3183_v39 = vld [vmem:[#allocation2 + $0x124] ss:$16 sps:$4 sm:$0xff]  }
  0x7c   :  { %v343_v38 = vunpack.c.l.s4 %v3706_v37  ;;  %v3185_v40 = vld [vmem:[#allocation2 + $0x12c] ss:$16 sps:$4 sm:$0xff]   ;;  %v3187_v41 = vld [vmem:[#allocation2 + $0x120] ss:$16 sps:$4 sm:$0xff]   ;;  %v3861_v42 = vshrl.u32 %v319_v36, 7  ;;  %vm3708_vm0 = vmmov 0  }
  0x7d   :  { %1339 = vmatpush1.bf16.msra.mxu0 %v3151_v14  ;;  %1462 = vmatpush1.bf16.msra.mxu1 %v3152_v15  ;;  %v3188_v44 = vld [vmem:[#allocation2 + $0x128] ss:$16 sps:$4 sm:$0xff]   ;;  %v3189_v45 = vld [vmem:[#allocation2 + $0x144] ss:$16 sps:$4 sm:$0xff]   ;;  %v3191_v46 = vld [vmem:[#allocation2 + $0x14c] ss:$16 sps:$4 sm:$0xff]  }
  0x7e   :  { %1340 = vmatprep.subr.bf16.mxu0 %v3153_v16  ;;  %1463 = vmatprep.subr.bf16.mxu1 %v3155_v17  ;;  %v344_v43 = vunpack.c.0.s8 %v343_v38  ;;  %v3193_v47 = vld [vmem:[#allocation2 + $0x140] ss:$16 sps:$4 sm:$0xff]   ;;  %v3194_v48 = vld [vmem:[#allocation2 + $0x148] ss:$16 sps:$4 sm:$0xff]   ;;  %v3195_v50 = vld [vmem:[#allocation2 + $0x164] ss:$16 sps:$4 sm:$0xff]  }
  0x7f   :  { %v3197_v51 = vld [vmem:[#allocation2 + $0x16c] ss:$16 sps:$4 sm:$0xff]   ;;  %v123_v52 = vld [vmem:[%s4257_s0] sm:$0xff]  ;;  %v3200_v55 = vld [vmem:[#allocation2 + $0x168] ss:$16 sps:$4 sm:$0xff]   ;;  %vm2465_vm1 = vcmask 523264  }
  0x80   :  { %v347_v49 = vsub.s32 %v344_v43, %v3861_v42  ;;  %v3199_v53 = vld [vmem:[#allocation2 + $0x160] ss:$16 sps:$4 sm:$0xff]   ;;  %v3201_v56 = vld [vmem:[#allocation2 + $0x184] ss:$16 sps:$4 sm:$0xff]   ;;  %v3203_v57 = vld [vmem:[#allocation2 + $0x18c] ss:$16 sps:$4 sm:$0xff]   ;;  %v341_v7 = vcombine.high %v123_v52, %v123_v52 }
  0x81   :  { %1341 = vmatpush1.bf16.msra.mxu0 %v3157_v18  ;;  %1464 = vmatpush1.bf16.msra.mxu1 %v3158_v19  ;;  %v3205_v59 = vld [vmem:[#allocation2 + $0x180] ss:$16 sps:$4 sm:$0xff]   ;;  %v3206_v60 = vld [vmem:[#allocation2 + $0x188] ss:$16 sps:$4 sm:$0xff]   ;;  %v3207_v61 = vld [vmem:[#allocation2 + $0x1a4] ss:$16 sps:$4 sm:$0xff]  }
  0x82   :  { %1342 = vmatprep.subr.bf16.mxu0 %v3159_v20  ;;  %1465 = vmatprep.subr.bf16.mxu1 %v3161_v21  ;;  %v348_v54 = vrot.slane %v123_v52, %v347_v49  ;;  %v3209_v62 = vld [vmem:[#allocation2 + $0x1ac] ss:$16 sps:$4 sm:$0xff]   ;;  %v3211_v63 = vld [vmem:[#allocation2 + $0x1a0] ss:$16 sps:$4 sm:$0xff]   ;;  %v3212_v0 = vld [vmem:[#allocation2 + $0x1a8] ss:$16 sps:$4 sm:$0xff]   ;;  %v3867_v12 = vrot.slane %v341_v7, %v347_v49 }
  0x83   :  { %v3213_v1 = vld [vmem:[#allocation2 + $0x1c4] ss:$16 sps:$4 sm:$0xff]   ;;  %v3215_v2 = vld [vmem:[#allocation2 + $0x1cc] ss:$16 sps:$4 sm:$0xff]   ;;  %v3217_v3 = vld [vmem:[#allocation2 + $0x1c0] ss:$16 sps:$4 sm:$0xff]  }
  0x84   :  { %v356_v58 = vcombine.high %v348_v54, %v348_v54  ;;  %v3218_v4 = vld [vmem:[#allocation2 + $0x1c8] ss:$16 sps:$4 sm:$0xff]   ;;  %v3219_v5 = vld [vmem:[#allocation2 + $0x1e4] ss:$16 sps:$4 sm:$0xff]   ;;  %v3221_v6 = vld [vmem:[#allocation2 + $0x1ec] ss:$16 sps:$4 sm:$0xff]   ;;  %v357_v17 = vcombine.high %v3867_v12, %v3867_v12 }
  0x85   :  { %1343 = vmatpush1.bf16.msra.mxu0 %v3163_v22  ;;  %1466 = vmatpush1.bf16.msra.mxu1 %v3164_v23  ;;  %v3223_v8 = vld [vmem:[#allocation2 + $0x1e0] ss:$16 sps:$4 sm:$0xff]   ;;  %v3224_v9 = vld [vmem:[#allocation2 + $0x1e8] ss:$16 sps:$4 sm:$0xff]   ;;  %v3228_v10 = vld [vmem:[#allocation2 + $0x204] ss:$16 sps:$4 sm:$0xff]  }
  0x86   :  { %1344 = vmatprep.subr.bf16.mxu0 %v3165_v24  ;;  %1467 = vmatprep.subr.bf16.mxu1 %v3167_v25  ;;  %v3231_v11 = vld [vmem:[#allocation2 + $0x20c] ss:$16 sps:$4 sm:$0xff]   ;;  %v3226_v13 = vld [vmem:[#allocation2 + $0x200] ss:$16 sps:$4 sm:$0xff]   ;;  %v3229_v14 = vld [vmem:[#allocation2 + $0x208] ss:$16 sps:$4 sm:$0xff]  }
  0x87   :  { %1364 = vmatprep.mubr.bf16.mxu0 %v356_v58  ;;  %1487 = vmatprep.mubr.bf16.mxu1 %v356_v58  ;;  %v3234_v15 = vld [vmem:[#allocation2 + $0x224] ss:$16 sps:$4 sm:$0xff]   ;;  %v3237_v16 = vld [vmem:[#allocation2 + $0x22c] ss:$16 sps:$4 sm:$0xff]   ;;  %v3232_v18 = vld [vmem:[#allocation2 + $0x220] ss:$16 sps:$4 sm:$0xff]  }
  0x88   :  { %v3235_v19 = vld [vmem:[#allocation2 + $0x228] ss:$16 sps:$4 sm:$0xff]   ;;  %v3240_v20 = vld [vmem:[#allocation2 + $0x244] ss:$16 sps:$4 sm:$0xff]   ;;  %v3243_v21 = vld [vmem:[#allocation2 + $0x24c] ss:$16 sps:$4 sm:$0xff]  }
  0x89   :  { %1345 = vmatpush1.bf16.msra.mxu0 %v3169_v26  ;;  %1468 = vmatpush1.bf16.msra.mxu1 %v3170_v27  ;;  %v3238_v22 = vld [vmem:[#allocation2 + $0x240] ss:$16 sps:$4 sm:$0xff]   ;;  %v3241_v23 = vld [vmem:[#allocation2 + $0x248] ss:$16 sps:$4 sm:$0xff]   ;;  %v3246_v24 = vld [vmem:[#allocation2 + $0x264] ss:$16 sps:$4 sm:$0xff]  }
  0x8a   :  { %1346 = vmatprep.subr.bf16.mxu0 %v3171_v28  ;;  %1469 = vmatprep.subr.bf16.mxu1 %v3173_v29  ;;  %v3249_v25 = vld [vmem:[#allocation2 + $0x26c] ss:$16 sps:$4 sm:$0xff]   ;;  %v3244_v26 = vld [vmem:[#allocation2 + $0x260] ss:$16 sps:$4 sm:$0xff]   ;;  %v3247_v27 = vld [vmem:[#allocation2 + $0x268] ss:$16 sps:$4 sm:$0xff]  }
  0x8b   :  { %v3252_v28 = vld [vmem:[#allocation2 + $0x284] ss:$16 sps:$4 sm:$0xff]   ;;  %v3255_v29 = vld [vmem:[#allocation2 + $0x28c] ss:$16 sps:$4 sm:$0xff]   ;;  %v3262_v38 = vld [vmem:[#allocation2 + $0x2c0] ss:$16 sps:$4 sm:$0xff]  }
  0x8c   :  { %v3264_v36 = vld [vmem:[#allocation2 + $0x2c4] ss:$16 sps:$4 sm:$0xff]   ;;  %v3267_v37 = vld [vmem:[#allocation2 + $0x2cc] ss:$16 sps:$4 sm:$0xff]   ;;  %v3268_v43 = vld [vmem:[#allocation2 + $0x2e0] ss:$16 sps:$4 sm:$0xff]  }
  0x8d   :  { %1347 = vmatpush1.bf16.msra.mxu0 %v3175_v30  ;;  %1470 = vmatpush1.bf16.msra.mxu1 %v3176_v31  ;;  %v3250_v30 = vld [vmem:[#allocation2 + $0x280] ss:$16 sps:$4 sm:$0xff]   ;;  %v3253_v31 = vld [vmem:[#allocation2 + $0x288] ss:$16 sps:$4 sm:$0xff]   ;;  %v3282_v49 = vld [vmem:[#allocation2 + $0x324] ss:$16 sps:$4 sm:$0xff]  }
  0x8e   :  { %1348 = vmatprep.subr.bf16.mxu0 %v3177_v32  ;;  %1471 = vmatprep.subr.bf16.mxu1 %v3179_v33  ;;  %v3258_v32 = vld [vmem:[#allocation2 + $0x2a4] ss:$16 sps:$4 sm:$0xff]   ;;  %v3261_v33 = vld [vmem:[#allocation2 + $0x2ac] ss:$16 sps:$4 sm:$0xff]   ;;  %v3283_v52 = vld [vmem:[#allocation2 + $0x328] ss:$16 sps:$4 sm:$0xff]  }
  0x8f   :  { %v3297_v58 = vld [vmem:[#allocation2 + $0x36c] ss:$16 sps:$4 sm:$0xff]   ;;  %v3310_v7 = vld [vmem:[#allocation2 + $0x3c0] ss:$16 sps:$4 sm:$0xff]   ;;  %vm2678_vm2 = vcmask 91136  }
  0x91   :  { %1349 = vmatpush1.bf16.msra.mxu0 %v3181_v34  ;;  %1472 = vmatpush1.bf16.msra.mxu1 %v3182_v35  ;;  %v3256_v34 = vld [vmem:[#allocation2 + $0x2a0] ss:$16 sps:$4 sm:$0xff]   ;;  %v3259_v35 = vld [vmem:[#allocation2 + $0x2a8] ss:$16 sps:$4 sm:$0xff]  }
  0x92   :  { %1350 = vmatprep.subr.bf16.mxu0 %v3183_v39  ;;  %1473 = vmatprep.subr.bf16.mxu1 %v3185_v40  ;;  %v3265_v39 = vld [vmem:[#allocation2 + $0x2c8] ss:$16 sps:$4 sm:$0xff]   ;;  %v3270_v40 = vld [vmem:[#allocation2 + $0x2e4] ss:$16 sps:$4 sm:$0xff]  }
  0x95   :  { %1351 = vmatpush1.bf16.msra.mxu0 %v3187_v41  ;;  %1474 = vmatpush1.bf16.msra.mxu1 %v3188_v44  ;;  %v3273_v41 = vld [vmem:[#allocation2 + $0x2ec] ss:$16 sps:$4 sm:$0xff]   ;;  %v3271_v44 = vld [vmem:[#allocation2 + $0x2e8] ss:$16 sps:$4 sm:$0xff]  }
  0x96   :  { %1352 = vmatprep.subr.bf16.mxu0 %v3189_v45  ;;  %1475 = vmatprep.subr.bf16.mxu1 %v3191_v46  ;;  %v3276_v45 = vld [vmem:[#allocation2 + $0x304] ss:$16 sps:$4 sm:$0xff]   ;;  %v3279_v46 = vld [vmem:[#allocation2 + $0x30c] ss:$16 sps:$4 sm:$0xff]  }
  0x99   :  { %1353 = vmatpush1.bf16.msra.mxu0 %v3193_v47  ;;  %1476 = vmatpush1.bf16.msra.mxu1 %v3194_v48  ;;  %v3274_v47 = vld [vmem:[#allocation2 + $0x300] ss:$16 sps:$4 sm:$0xff]   ;;  %v3277_v48 = vld [vmem:[#allocation2 + $0x308] ss:$16 sps:$4 sm:$0xff]  }
  0x9a   :  { %1354 = vmatprep.subr.bf16.mxu0 %v3195_v50  ;;  %1477 = vmatprep.subr.bf16.mxu1 %v3197_v51  ;;  %v3285_v50 = vld [vmem:[#allocation2 + $0x32c] ss:$16 sps:$4 sm:$0xff]   ;;  %v3280_v51 = vld [vmem:[#allocation2 + $0x320] ss:$16 sps:$4 sm:$0xff]  }
  0x9d   :  { %1355 = vmatpush1.bf16.msra.mxu0 %v3199_v53  ;;  %1478 = vmatpush1.bf16.msra.mxu1 %v3200_v55  ;;  %v3288_v53 = vld [vmem:[#allocation2 + $0x344] ss:$16 sps:$4 sm:$0xff]   ;;  %v3286_v55 = vld [vmem:[#allocation2 + $0x340] ss:$16 sps:$4 sm:$0xff]  }
  0x9e   :  { %1356 = vmatprep.subr.bf16.mxu0 %v3201_v56  ;;  %1479 = vmatprep.subr.bf16.mxu1 %v3203_v57  ;;  %v3289_v56 = vld [vmem:[#allocation2 + $0x348] ss:$16 sps:$4 sm:$0xff]   ;;  %v3294_v57 = vld [vmem:[#allocation2 + $0x364] ss:$16 sps:$4 sm:$0xff]  }
  0xa1   :  { %1357 = vmatpush1.bf16.msra.mxu0 %v3205_v59  ;;  %1480 = vmatpush1.bf16.msra.mxu1 %v3206_v60  ;;  %v3292_v59 = vld [vmem:[#allocation2 + $0x360] ss:$16 sps:$4 sm:$0xff]   ;;  %v3295_v60 = vld [vmem:[#allocation2 + $0x368] ss:$16 sps:$4 sm:$0xff]  }
  0xa2   :  { %1358 = vmatprep.subr.bf16.mxu0 %v3207_v61  ;;  %1481 = vmatprep.subr.bf16.mxu1 %v3209_v62  ;;  %v3300_v61 = vld [vmem:[#allocation2 + $0x384] ss:$16 sps:$4 sm:$0xff]   ;;  %v3303_v62 = vld [vmem:[#allocation2 + $0x38c] ss:$16 sps:$4 sm:$0xff]  }
  0xa5   :  { %1359 = vmatpush1.bf16.msra.mxu0 %v3211_v63  ;;  %1482 = vmatpush1.bf16.msra.mxu1 %v3212_v0  ;;  %v3298_v63 = vld [vmem:[#allocation2 + $0x380] ss:$16 sps:$4 sm:$0xff]   ;;  %v3301_v0 = vld [vmem:[#allocation2 + $0x388] ss:$16 sps:$4 sm:$0xff]  }
  0xa6   :  { %1360 = vmatprep.subr.bf16.mxu0 %v3213_v1  ;;  %1483 = vmatprep.subr.bf16.mxu1 %v3215_v2  ;;  %v3306_v1 = vld [vmem:[#allocation2 + $0x3a4] ss:$16 sps:$4 sm:$0xff]   ;;  %v3309_v2 = vld [vmem:[#allocation2 + $0x3ac] ss:$16 sps:$4 sm:$0xff]  }
  0xa9   :  { %1361 = vmatpush1.bf16.msra.mxu0 %v3217_v3  ;;  %1484 = vmatpush1.bf16.msra.mxu1 %v3218_v4  ;;  %v3304_v3 = vld [vmem:[#allocation2 + $0x3a0] ss:$16 sps:$4 sm:$0xff]   ;;  %v3307_v4 = vld [vmem:[#allocation2 + $0x3a8] ss:$16 sps:$4 sm:$0xff]  }
  0xaa   :  { %1362 = vmatprep.subr.bf16.mxu0 %v3219_v5  ;;  %1485 = vmatprep.subr.bf16.mxu1 %v3221_v6  ;;  %v3312_v5 = vld [vmem:[#allocation2 + $0x3c4] ss:$16 sps:$4 sm:$0xff]   ;;  %v3315_v6 = vld [vmem:[#allocation2 + $0x3cc] ss:$16 sps:$4 sm:$0xff]  }
  0xad   :  { %1363 = vmatpush1.bf16.msra.mxu0 %v3223_v8  ;;  %1486 = vmatpush1.bf16.msra.mxu1 %v3224_v9  ;;  %v3313_v8 = vld [vmem:[#allocation2 + $0x3c8] ss:$16 sps:$4 sm:$0xff]   ;;  %v3318_v9 = vld [vmem:[#allocation2 + $0x3e4] ss:$16 sps:$4 sm:$0xff]  }
  0xae   :  { %1373 = vmatprep.subr.bf16.mxu0 %v3228_v10  ;;  %1496 = vmatprep.subr.bf16.mxu1 %v3231_v11  ;;  %v3321_v10 = vld [vmem:[#allocation2 + $0x3ec] ss:$16 sps:$4 sm:$0xff]   ;;  %v3316_v11 = vld [vmem:[#allocation2 + $0x3e0] ss:$16 sps:$4 sm:$0xff]  }
  0xb0   :  { %1365 = vmatmul.mubr.bf16.vlgmr.msra.gmra.mrb[0].mxu0 %v348_v54  ;;  %1488 = vmatmul.mubr.bf16.vlgmr.msra.gmra.mrb[0].mxu1 %v348_v54  ;;  %v3291_v54 = vld [vmem:[#allocation2 + $0x34c] ss:$16 sps:$4 sm:$0xff]  }
  0xb1   :  { %1374 = vmatpush1.bf16.msra.mxu0 %v3226_v13  ;;  %1497 = vmatpush1.bf16.msra.mxu1 %v3229_v14  ;;  %v3319_v13 = vld [vmem:[#allocation2 + $0x3e8] ss:$16 sps:$4 sm:$0xff]   ;;  %v3324_v14 = vld [vmem:[#allocation2 + $0x404] ss:$16 sps:$4 sm:$0xff]  }
  0xb2   :  { %1375 = vmatprep.subr.bf16.mxu0 %v3234_v15  ;;  %1498 = vmatprep.subr.bf16.mxu1 %v3237_v16  ;;  %v3327_v15 = vld [vmem:[#allocation2 + $0x40c] ss:$16 sps:$4 sm:$0xff]   ;;  %v3322_v16 = vld [vmem:[#allocation2 + $0x400] ss:$16 sps:$4 sm:$0xff]  }
  0xb3   :  { %1405 = vmatprep.mubr.bf16.mxu0 %v357_v17  ;;  %1528 = vmatprep.mubr.bf16.mxu1 %v357_v17  ;;  %v3325_v17 = vld [vmem:[#allocation2 + $0x408] ss:$16 sps:$4 sm:$0xff]  }
  0xb5   :  { %1376 = vmatpush1.bf16.msra.mxu0 %v3232_v18  ;;  %1499 = vmatpush1.bf16.msra.mxu1 %v3235_v19  ;;  %v3330_v18 = vld [vmem:[#allocation2 + $0x424] ss:$16 sps:$4 sm:$0xff]   ;;  %v3874_v19 = vld.sshfl [vmem:[%s4257_s0 + $0x8] sm:$0x33 pattern:$0x76325410] }
  0xb6   :  { %1377 = vmatprep.subr.bf16.mxu0 %v3240_v20  ;;  %1500 = vmatprep.subr.bf16.mxu1 %v3243_v21  ;;  %v3333_v20 = vld [vmem:[#allocation2 + $0x42c] ss:$16 sps:$4 sm:$0xff]   ;;  %v365_v21 = vcombine.high %v3874_v19, %v3874_v19 }
  0xb9   :  { %1378 = vmatpush1.bf16.msra.mxu0 %v3238_v22  ;;  %1501 = vmatpush1.bf16.msra.mxu1 %v3241_v23  ;;  %v3328_v22 = vld [vmem:[#allocation2 + $0x420] ss:$16 sps:$4 sm:$0xff]   ;;  %v3331_v23 = vld [vmem:[#allocation2 + $0x428] ss:$16 sps:$4 sm:$0xff]  }
  0xba   :  { %1379 = vmatprep.subr.bf16.mxu0 %v3246_v24  ;;  %1502 = vmatprep.subr.bf16.mxu1 %v3249_v25  ;;  %v3336_v24 = vld [vmem:[#allocation2 + $0x444] ss:$16 sps:$4 sm:$0xff]   ;;  %v3339_v25 = vld [vmem:[#allocation2 + $0x44c] ss:$16 sps:$4 sm:$0xff]  }
  0xbd   :  { %1380 = vmatpush1.bf16.msra.mxu0 %v3244_v26  ;;  %1503 = vmatpush1.bf16.msra.mxu1 %v3247_v27  ;;  %v3334_v26 = vld [vmem:[#allocation2 + $0x440] ss:$16 sps:$4 sm:$0xff]   ;;  %v3337_v27 = vld [vmem:[#allocation2 + $0x448] ss:$16 sps:$4 sm:$0xff]  }
  0xbe   :  { %1381 = vmatprep.subr.bf16.mxu0 %v3252_v28  ;;  %1504 = vmatprep.subr.bf16.mxu1 %v3255_v29  ;;  %v3342_v28 = vld [vmem:[#allocation2 + $0x464] ss:$16 sps:$4 sm:$0xff]   ;;  %v3345_v29 = vld [vmem:[#allocation2 + $0x46c] ss:$16 sps:$4 sm:$0xff]  }
  0xc1   :  { %1382 = vmatpush1.bf16.msra.mxu0 %v3250_v30  ;;  %1505 = vmatpush1.bf16.msra.mxu1 %v3253_v31  ;;  %v3340_v30 = vld [vmem:[#allocation2 + $0x460] ss:$16 sps:$4 sm:$0xff]   ;;  %v3348_v31 = vld [vmem:[#allocation2 + $0x484] ss:$16 sps:$4 sm:$0xff]  }
  0xc2   :  { %1383 = vmatprep.subr.bf16.mxu0 %v3258_v32  ;;  %1506 = vmatprep.subr.bf16.mxu1 %v3261_v33  ;;  %v3351_v32 = vld [vmem:[#allocation2 + $0x48c] ss:$16 sps:$4 sm:$0xff]   ;;  %v3346_v33 = vld [vmem:[#allocation2 + $0x480] ss:$16 sps:$4 sm:$0xff]  }
  0xc5   :  { %1384 = vmatpush1.bf16.msra.mxu0 %v3256_v34  ;;  %1507 = vmatpush1.bf16.msra.mxu1 %v3259_v35  ;;  %v3349_v34 = vld [vmem:[#allocation2 + $0x488] ss:$16 sps:$4 sm:$0xff]   ;;  %v3354_v35 = vld [vmem:[#allocation2 + $0x4a4] ss:$16 sps:$4 sm:$0xff]  }
  0xc6   :  { %1385 = vmatprep.subr.bf16.mxu0 %v3264_v36  ;;  %1508 = vmatprep.subr.bf16.mxu1 %v3267_v37  ;;  %v3357_v36 = vld [vmem:[#allocation2 + $0x4ac] ss:$16 sps:$4 sm:$0xff]   ;;  %v3352_v37 = vld [vmem:[#allocation2 + $0x4a0] ss:$16 sps:$4 sm:$0xff]  }
  0xc9   :  { %1386 = vmatpush1.bf16.msra.mxu0 %v3262_v38  ;;  %1509 = vmatpush1.bf16.msra.mxu1 %v3265_v39  ;;  %v3355_v38 = vld [vmem:[#allocation2 + $0x4a8] ss:$16 sps:$4 sm:$0xff]   ;;  %v3360_v39 = vld [vmem:[#allocation2 + $0x4c4] ss:$16 sps:$4 sm:$0xff]  }
  0xca   :  { %1387 = vmatprep.subr.bf16.mxu0 %v3270_v40  ;;  %1510 = vmatprep.subr.bf16.mxu1 %v3273_v41  ;;  %v3363_v40 = vld [vmem:[#allocation2 + $0x4cc] ss:$16 sps:$4 sm:$0xff]   ;;  %v3358_v41 = vld [vmem:[#allocation2 + $0x4c0] ss:$16 sps:$4 sm:$0xff]  }
  0xcd   :  { %1388 = vmatpush1.bf16.msra.mxu0 %v3268_v43  ;;  %1511 = vmatpush1.bf16.msra.mxu1 %v3271_v44  ;;  %v3361_v43 = vld [vmem:[#allocation2 + $0x4c8] ss:$16 sps:$4 sm:$0xff]   ;;  %v3366_v44 = vld [vmem:[#allocation2 + $0x4e4] ss:$16 sps:$4 sm:$0xff]  }
  0xce   :  { %1389 = vmatprep.subr.bf16.mxu0 %v3276_v45  ;;  %1512 = vmatprep.subr.bf16.mxu1 %v3279_v46  ;;  %v3369_v45 = vld [vmem:[#allocation2 + $0x4ec] ss:$16 sps:$4 sm:$0xff]   ;;  %v3364_v46 = vld [vmem:[#allocation2 + $0x4e0] ss:$16 sps:$4 sm:$0xff]  }
  0xd1   :  { %1390 = vmatpush1.bf16.msra.mxu0 %v3274_v47  ;;  %1513 = vmatpush1.bf16.msra.mxu1 %v3277_v48  ;;  %v3367_v47 = vld [vmem:[#allocation2 + $0x4e8] ss:$16 sps:$4 sm:$0xff]   ;;  %v3372_v48 = vld [vmem:[#allocation2 + $0x504] ss:$16 sps:$4 sm:$0xff]  }
  0xd2   :  { %1391 = vmatprep.subr.bf16.mxu0 %v3282_v49  ;;  %1514 = vmatprep.subr.bf16.mxu1 %v3285_v50  ;;  %v3375_v49 = vld [vmem:[#allocation2 + $0x50c] ss:$16 sps:$4 sm:$0xff]   ;;  %v3370_v50 = vld [vmem:[#allocation2 + $0x500] ss:$16 sps:$4 sm:$0xff]  }
  0xd5   :  { %1392 = vmatpush1.bf16.msra.mxu0 %v3280_v51  ;;  %1515 = vmatpush1.bf16.msra.mxu1 %v3283_v52  ;;  %v3373_v51 = vld [vmem:[#allocation2 + $0x508] ss:$16 sps:$4 sm:$0xff]   ;;  %v3378_v52 = vld [vmem:[#allocation2 + $0x524] ss:$16 sps:$4 sm:$0xff]  }
  0xd6   :  { %1393 = vmatprep.subr.bf16.mxu0 %v3288_v53  ;;  %1516 = vmatprep.subr.bf16.mxu1 %v3291_v54  ;;  %v3381_v53 = vld [vmem:[#allocation2 + $0x52c] ss:$16 sps:$4 sm:$0xff]   ;;  %v3376_v54 = vld [vmem:[#allocation2 + $0x520] ss:$16 sps:$4 sm:$0xff]  }
  0xd9   :  { %1394 = vmatpush1.bf16.msra.mxu0 %v3286_v55  ;;  %1517 = vmatpush1.bf16.msra.mxu1 %v3289_v56  ;;  %v3379_v55 = vld [vmem:[#allocation2 + $0x528] ss:$16 sps:$4 sm:$0xff]   ;;  %v3384_v56 = vld [vmem:[#allocation2 + $0x544] ss:$16 sps:$4 sm:$0xff]  }
  0xda   :  { %1395 = vmatprep.subr.bf16.mxu0 %v3294_v57  ;;  %1518 = vmatprep.subr.bf16.mxu1 %v3297_v58  ;;  %v3387_v57 = vld [vmem:[#allocation2 + $0x54c] ss:$16 sps:$4 sm:$0xff]   ;;  %v3382_v58 = vld [vmem:[#allocation2 + $0x540] ss:$16 sps:$4 sm:$0xff]  }
  0xdd   :  { %1396 = vmatpush1.bf16.msra.mxu0 %v3292_v59  ;;  %1519 = vmatpush1.bf16.msra.mxu1 %v3295_v60  ;;  %v3385_v59 = vld [vmem:[#allocation2 + $0x548] ss:$16 sps:$4 sm:$0xff]   ;;  %v3390_v60 = vld [vmem:[#allocation2 + $0x564] ss:$16 sps:$4 sm:$0xff]  }
  0xde   :  { %1397 = vmatprep.subr.bf16.mxu0 %v3300_v61  ;;  %1520 = vmatprep.subr.bf16.mxu1 %v3303_v62  ;;  %v3393_v61 = vld [vmem:[#allocation2 + $0x56c] ss:$16 sps:$4 sm:$0xff]   ;;  %v3388_v62 = vld [vmem:[#allocation2 + $0x560] ss:$16 sps:$4 sm:$0xff]  }
  0xe1   :  { %1398 = vmatpush1.bf16.msra.mxu0 %v3298_v63  ;;  %1521 = vmatpush1.bf16.msra.mxu1 %v3301_v0  ;;  %v3391_v63 = vld [vmem:[#allocation2 + $0x568] ss:$16 sps:$4 sm:$0xff]   ;;  %v3396_v0 = vld [vmem:[#allocation2 + $0x584] ss:$16 sps:$4 sm:$0xff]  }
  0xe2   :  { %1399 = vmatprep.subr.bf16.mxu0 %v3306_v1  ;;  %1522 = vmatprep.subr.bf16.mxu1 %v3309_v2  ;;  %v3399_v1 = vld [vmem:[#allocation2 + $0x58c] ss:$16 sps:$4 sm:$0xff]   ;;  %v3394_v2 = vld [vmem:[#allocation2 + $0x580] ss:$16 sps:$4 sm:$0xff]  }
  0xe5   :  { %1400 = vmatpush1.bf16.msra.mxu0 %v3304_v3  ;;  %1523 = vmatpush1.bf16.msra.mxu1 %v3307_v4  ;;  %v3397_v3 = vld [vmem:[#allocation2 + $0x588] ss:$16 sps:$4 sm:$0xff]   ;;  %v3402_v4 = vld [vmem:[#allocation2 + $0x5a4] ss:$16 sps:$4 sm:$0xff]  }
  0xe6   :  { %1401 = vmatprep.subr.bf16.mxu0 %v3312_v5  ;;  %1524 = vmatprep.subr.bf16.mxu1 %v3315_v6  ;;  %v3405_v5 = vld [vmem:[#allocation2 + $0x5ac] ss:$16 sps:$4 sm:$0xff]   ;;  %v3400_v6 = vld [vmem:[#allocation2 + $0x5a0] ss:$16 sps:$4 sm:$0xff]  }
  0xe9   :  { %1402 = vmatpush1.bf16.msra.mxu0 %v3310_v7  ;;  %1525 = vmatpush1.bf16.msra.mxu1 %v3313_v8  ;;  %v3403_v7 = vld [vmem:[#allocation2 + $0x5a8] ss:$16 sps:$4 sm:$0xff]   ;;  %v3408_v8 = vld [vmem:[#allocation2 + $0x5c4] ss:$16 sps:$4 sm:$0xff]  }
  0xea   :  { %1403 = vmatprep.subr.bf16.mxu0 %v3318_v9  ;;  %1526 = vmatprep.subr.bf16.mxu1 %v3321_v10  ;;  %v3411_v9 = vld [vmem:[#allocation2 + $0x5cc] ss:$16 sps:$4 sm:$0xff]   ;;  %v3406_v10 = vld [vmem:[#allocation2 + $0x5c0] ss:$16 sps:$4 sm:$0xff]  }
  0xed   :  { %1404 = vmatpush1.bf16.msra.mxu0 %v3316_v11  ;;  %1527 = vmatpush1.bf16.msra.mxu1 %v3319_v13  ;;  %v3409_v11 = vld [vmem:[#allocation2 + $0x5c8] ss:$16 sps:$4 sm:$0xff]   ;;  %v3414_v13 = vld [vmem:[#allocation2 + $0x5e4] ss:$16 sps:$4 sm:$0xff]  }
  0xee   :  { %1414 = vmatprep.subr.bf16.mxu0 %v3324_v14  ;;  %1537 = vmatprep.subr.bf16.mxu1 %v3327_v15  ;;  %v3417_v14 = vld [vmem:[#allocation2 + $0x5ec] ss:$16 sps:$4 sm:$0xff]   ;;  %v3412_v15 = vld [vmem:[#allocation2 + $0x5e0] ss:$16 sps:$4 sm:$0xff]  }
  0xf0   :  { %1406 = vmatmul.mubr.bf16.vlgmr.msra.gmra.mrb[0].mxu0 %v3867_v12  ;;  %1529 = vmatmul.mubr.bf16.vlgmr.msra.gmra.mrb[0].mxu1 %v3867_v12  ;;  %v3343_v12 = vld [vmem:[#allocation2 + $0x468] ss:$16 sps:$4 sm:$0xff]  }
  0xf1   :  { %1415 = vmatpush1.bf16.msra.mxu0 %v3322_v16  ;;  %1538 = vmatpush1.bf16.msra.mxu1 %v3325_v17  ;;  %v3415_v16 = vld [vmem:[#allocation2 + $0x5e8] ss:$16 sps:$4 sm:$0xff]   ;;  %v3420_v17 = vld [vmem:[%s4260_s3 + $0x4] ss:$8 sps:$4 sm:$0xff]  }
  0xf2   :  { %1416 = vmatprep.subr.bf16.mxu0 %v3330_v18  ;;  %1539 = vmatprep.subr.bf16.mxu1 %v3333_v20  ;;  %v3418_v18 = vld [vmem:[%s4260_s3] ss:$8 sps:$4 sm:$0xff]   ;;  %v3423_v20 = vld [vmem:[%s4260_s3 + $0x14] ss:$8 sps:$4 sm:$0xff]  }
  0xf3   :  { %1446 = vmatprep.mubr.bf16.mxu0 %v365_v21  ;;  %1569 = vmatprep.mubr.bf16.mxu1 %v365_v21  ;;  %v3421_v21 = vld [vmem:[%s4260_s3 + $0x10] ss:$8 sps:$4 sm:$0xff]  }
  0xf5   :  { %1417 = vmatpush1.bf16.msra.mxu0 %v3328_v22  ;;  %1540 = vmatpush1.bf16.msra.mxu1 %v3331_v23  ;;  %v3426_v22 = vld [vmem:[%s4260_s3 + $0x24] ss:$8 sps:$4 sm:$0xff]   ;;  %v3424_v23 = vld [vmem:[%s4260_s3 + $0x20] ss:$8 sps:$4 sm:$0xff]  }
  0xf6   :  { %1418 = vmatprep.subr.bf16.mxu0 %v3336_v24  ;;  %1541 = vmatprep.subr.bf16.mxu1 %v3339_v25  ;;  %v3427_v24 = vld [vmem:[%s4260_s3 + $0x30] ss:$8 sps:$4 sm:$0xff]   ;;  %v3432_v25 = vld [vmem:[%s4260_s3 + $0x44] ss:$8 sps:$4 sm:$0xff]  }
  0xf9   :  { %1419 = vmatpush1.bf16.msra.mxu0 %v3334_v26  ;;  %1542 = vmatpush1.bf16.msra.mxu1 %v3337_v27  ;;  %v3430_v26 = vld [vmem:[%s4260_s3 + $0x40] ss:$8 sps:$4 sm:$0xff]   ;;  %v3435_v27 = vld [vmem:[%s4260_s3 + $0x54] ss:$8 sps:$4 sm:$0xff]  }
  0xfa   :  { %1420 = vmatprep.subr.bf16.mxu0 %v3342_v28  ;;  %1543 = vmatprep.subr.bf16.mxu1 %v3345_v29  ;;  %v3433_v28 = vld [vmem:[%s4260_s3 + $0x50] ss:$8 sps:$4 sm:$0xff]   ;;  %v3438_v29 = vld [vmem:[%s4260_s3 + $0x64] ss:$8 sps:$4 sm:$0xff]  }
  0xfd   :  { %1421 = vmatpush1.bf16.msra.mxu0 %v3340_v30  ;;  %1544 = vmatpush1.bf16.msra.mxu1 %v3343_v12  ;;  %v3436_v30 = vld [vmem:[%s4260_s3 + $0x60] ss:$8 sps:$4 sm:$0xff]   ;;  %v3441_v12 = vld [vmem:[%s4260_s3 + $0x74] ss:$8 sps:$4 sm:$0xff]  }
  0xfe   :  { %1422 = vmatprep.subr.bf16.mxu0 %v3348_v31  ;;  %1545 = vmatprep.subr.bf16.mxu1 %v3351_v32  ;;  %v3439_v31 = vld [vmem:[%s4260_s3 + $0x70] ss:$8 sps:$4 sm:$0xff]   ;;  %v3444_v32 = vld [vmem:[%s4260_s3 + $0x84] ss:$8 sps:$4 sm:$0xff]  }
 0x101   :  { %1423 = vmatpush1.bf16.msra.mxu0 %v3346_v33  ;;  %1546 = vmatpush1.bf16.msra.mxu1 %v3349_v34  ;;  %v3442_v33 = vld [vmem:[%s4260_s3 + $0x80] ss:$8 sps:$4 sm:$0xff]   ;;  %v3447_v34 = vld [vmem:[%s4260_s3 + $0x94] ss:$8 sps:$4 sm:$0xff]  }
 0x102   :  { %1424 = vmatprep.subr.bf16.mxu0 %v3354_v35  ;;  %1547 = vmatprep.subr.bf16.mxu1 %v3357_v36  ;;  %v3445_v35 = vld [vmem:[%s4260_s3 + $0x90] ss:$8 sps:$4 sm:$0xff]   ;;  %v3450_v36 = vld [vmem:[%s4260_s3 + $0xa4] ss:$8 sps:$4 sm:$0xff]  }
 0x105   :  { %1425 = vmatpush1.bf16.msra.mxu0 %v3352_v37  ;;  %1548 = vmatpush1.bf16.msra.mxu1 %v3355_v38  ;;  %v3448_v37 = vld [vmem:[%s4260_s3 + $0xa0] ss:$8 sps:$4 sm:$0xff]   ;;  %v3453_v38 = vld [vmem:[%s4260_s3 + $0xb4] ss:$8 sps:$4 sm:$0xff]  }
 0x106   :  { %1426 = vmatprep.subr.bf16.mxu0 %v3360_v39  ;;  %1549 = vmatprep.subr.bf16.mxu1 %v3363_v40  ;;  %v3451_v39 = vld [vmem:[%s4260_s3 + $0xb0] ss:$8 sps:$4 sm:$0xff]   ;;  %v3456_v40 = vld [vmem:[%s4260_s3 + $0xc4] ss:$8 sps:$4 sm:$0xff]  }
 0x109   :  { %1427 = vmatpush1.bf16.msra.mxu0 %v3358_v41  ;;  %1550 = vmatpush1.bf16.msra.mxu1 %v3361_v43  ;;  %v3454_v41 = vld [vmem:[%s4260_s3 + $0xc0] ss:$8 sps:$4 sm:$0xff]   ;;  %v3459_v43 = vld [vmem:[%s4260_s3 + $0xd4] ss:$8 sps:$4 sm:$0xff]  }
 0x10a   :  { %1428 = vmatprep.subr.bf16.mxu0 %v3366_v44  ;;  %1551 = vmatprep.subr.bf16.mxu1 %v3369_v45  ;;  %v3457_v44 = vld [vmem:[%s4260_s3 + $0xd0] ss:$8 sps:$4 sm:$0xff]   ;;  %v3462_v45 = vld [vmem:[%s4260_s3 + $0xe4] ss:$8 sps:$4 sm:$0xff]  }
 0x10d   :  { %1429 = vmatpush1.bf16.msra.mxu0 %v3364_v46  ;;  %1552 = vmatpush1.bf16.msra.mxu1 %v3367_v47  ;;  %v3460_v46 = vld [vmem:[%s4260_s3 + $0xe0] ss:$8 sps:$4 sm:$0xff]   ;;  %v3465_v47 = vld [vmem:[%s4260_s3 + $0xf4] ss:$8 sps:$4 sm:$0xff]  }
 0x10e   :  { %1430 = vmatprep.subr.bf16.mxu0 %v3372_v48  ;;  %1553 = vmatprep.subr.bf16.mxu1 %v3375_v49  ;;  %v3463_v48 = vld [vmem:[%s4260_s3 + $0xf0] ss:$8 sps:$4 sm:$0xff]   ;;  %v3468_v49 = vld [vmem:[%s4260_s3 + $0x104] ss:$8 sps:$4 sm:$0xff]  }
 0x111   :  { %1431 = vmatpush1.bf16.msra.mxu0 %v3370_v50  ;;  %1554 = vmatpush1.bf16.msra.mxu1 %v3373_v51  ;;  %v3514_v50 = vld [vmem:[%s4262_s5 + $0x40] sm:$0xff]  }
 0x112   :  { %1432 = vmatprep.subr.bf16.mxu0 %v3378_v52  ;;  %1555 = vmatprep.subr.bf16.mxu1 %v3381_v53  ;;  %v3515_v51 = vld [vmem:[%s4262_s5] sm:$0xff]   ;;  %v3516_v52 = vld [vmem:[%s4262_s5 + $0x48] sm:$0xff]  }
 0x113   :  { %v3517_v53 = vld [vmem:[%s4262_s5 + $0x8] sm:$0xff]  }
 0x115   :  { %1433 = vmatpush1.bf16.msra.mxu0 %v3376_v54  ;;  %1556 = vmatpush1.bf16.msra.mxu1 %v3379_v55  ;;  %v3518_v54 = vld [vmem:[%s4262_s5 + $0x50] sm:$0xff]  }
 0x116   :  { %1434 = vmatprep.subr.bf16.mxu0 %v3384_v56  ;;  %1557 = vmatprep.subr.bf16.mxu1 %v3387_v57  ;;  %v3519_v55 = vld [vmem:[%s4262_s5 + $0x10] sm:$0xff]   ;;  %v3520_v56 = vld [vmem:[%s4262_s5 + $0x58] sm:$0xff]  }
 0x117   :  { %v3521_v57 = vld [vmem:[%s4262_s5 + $0x18] sm:$0xff]  }
 0x119   :  { %1435 = vmatpush1.bf16.msra.mxu0 %v3382_v58  ;;  %1558 = vmatpush1.bf16.msra.mxu1 %v3385_v59  ;;  %v3522_v58 = vld [vmem:[%s4262_s5 + $0x60] sm:$0xff]  }
 0x11a   :  { %1436 = vmatprep.subr.bf16.mxu0 %v3390_v60  ;;  %1559 = vmatprep.subr.bf16.mxu1 %v3393_v61  ;;  %v3523_v59 = vld [vmem:[%s4262_s5 + $0x20] sm:$0xff]   ;;  %v3524_v60 = vld [vmem:[%s4262_s5 + $0x68] sm:$0xff]  }
 0x11b   :  { %v3525_v61 = vld [vmem:[%s4262_s5 + $0x28] sm:$0xff]  }
 0x11d   :  { %1437 = vmatpush1.bf16.msra.mxu0 %v3388_v62  ;;  %1560 = vmatpush1.bf16.msra.mxu1 %v3391_v63  ;;  %v321_v62 = vsub.s32 0, %v3861_v42  ;;  %v4021_v63 = vld [vmem:[%s4259_s2] sm:$0xf] }
 0x11e   :  { %1438 = vmatprep.subr.bf16.mxu0 %v3396_v0  ;;  %1561 = vmatprep.subr.bf16.mxu1 %v3399_v1  ;;  %v325_v0 = vsub.s32 1, %v3861_v42  ;;  %v333_v1 = vsub.s32 3, %v3861_v42 }
 0x121   :  { %1439 = vmatpush1.bf16.msra.mxu0 %v3394_v2  ;;  %1562 = vmatpush1.bf16.msra.mxu1 %v3397_v3  ;;  %v322_v2 = vrot.slane %v4021_v63, %v321_v62  ;;  %v326_v3 = vrot.slane %v4021_v63, %v325_v0 }
 0x122   :  { %1440 = vmatprep.subr.bf16.mxu0 %v3402_v4  ;;  %1563 = vmatprep.subr.bf16.mxu1 %v3405_v5  ;;  %v334_v4 = vrot.slane %v4021_v63, %v333_v1  ;;  %v3530_v1 = vld [vmem:[%s4264_s7 + $0x40] sm:$0xff]  }
 0x125   :  { %1441 = vmatpush1.bf16.msra.mxu0 %v3400_v6  ;;  %1564 = vmatpush1.bf16.msra.mxu1 %v3403_v7 }
 0x126   :  { %1442 = vmatprep.subr.bf16.mxu0 %v3408_v8  ;;  %1565 = vmatprep.subr.bf16.mxu1 %v3411_v9 }
 0x129   :  { %1443 = vmatpush1.bf16.msra.mxu0 %v3406_v10  ;;  %1566 = vmatpush1.bf16.msra.mxu1 %v3409_v11 }
 0x12a   :  { %1444 = vmatprep.subr.bf16.mxu0 %v3414_v13  ;;  %1567 = vmatprep.subr.bf16.mxu1 %v3417_v14 }
 0x12d   :  { %1445 = vmatpush1.bf16.msra.mxu0 %v3412_v15  ;;  %1568 = vmatpush1.bf16.msra.mxu1 %v3415_v16 }
 0x12e   :  { %1982 = vmatprep.subr.bf16.mxu0 %v3420_v17  ;;  %2997 = vmatprep.subr.bf16.mxu1 %v3514_v50  ;;  %v3505_v50 = vld [vmem:[%s4260_s3 + $0x1d0] ss:$8 sps:$4 sm:$0xff]  }
 0x130   :  { %1447 = vmatmul.mubr.bf16.vlgmr.msra.gmra.mrb[0].mxu0 %v3874_v19  ;;  %1570 = vmatmul.mubr.bf16.vlgmr.msra.gmra.mrb[0].mxu1 %v3874_v19  ;;  %v3429_v19 = vld [vmem:[%s4260_s3 + $0x34] ss:$8 sps:$4 sm:$0xff]  }
 0x131   :  { %1983 = vmatpush1.bf16.msra.mxu0 %v3418_v18  ;;  %2998 = vmatpush3.bf16.msra.mxu1 %v3515_v51 }
 0x132   :  { %1984 = vmatprep.subr.bf16.mxu0 %v3423_v20  ;;  %2999 = vmatprep.subr.bf16.mxu1 %v3516_v52  ;;  %v3510_v52 = vld [vmem:[%s4260_s3 + $0x1e4] ss:$8 sps:$4 sm:$0xff]  }
 0x135   :  { %1985 = vmatpush1.bf16.msra.mxu0 %v3421_v21  ;;  %3000 = vmatpush3.bf16.msra.mxu1 %v3517_v53  ;;  %v3508_v53 = vld [vmem:[%s4260_s3 + $0x1e0] ss:$8 sps:$4 sm:$0xff]  }
 0x136   :  { %1986 = vmatprep.subr.bf16.mxu0 %v3426_v22  ;;  %3001 = vmatprep.subr.bf16.mxu1 %v3518_v54  ;;  %v3466_v22 = vld [vmem:[%s4260_s3 + $0x100] ss:$8 sps:$4 sm:$0xff]  }
 0x139   :  { %1987 = vmatpush1.bf16.msra.mxu0 %v3424_v23  ;;  %3002 = vmatpush3.bf16.msra.mxu1 %v3519_v55  ;;  %v3513_v55 = vld [vmem:[%s4260_s3 + $0x1f4] ss:$8 sps:$4 sm:$0xff]  }
 0x13a   :  { %1988 = vmatprep.subr.bf16.mxu0 %v3429_v19  ;;  %3003 = vmatprep.subr.bf16.mxu1 %v3520_v56  ;;  %v3471_v19 = vld [vmem:[%s4260_s3 + $0x114] ss:$8 sps:$4 sm:$0xff]   ;;  %v3511_v56 = vld [vmem:[%s4260_s3 + $0x1f0] ss:$8 sps:$4 sm:$0xff]  }
 0x13d   :  { %1989 = vmatpush1.bf16.msra.mxu0 %v3427_v24  ;;  %3004 = vmatpush3.bf16.msra.mxu1 %v3521_v57 }
 0x13e   :  { %1990 = vmatprep.subr.bf16.mxu0 %v3432_v25  ;;  %3005 = vmatprep.subr.bf16.mxu1 %v3522_v58  ;;  %v3469_v25 = vld [vmem:[%s4260_s3 + $0x110] ss:$8 sps:$4 sm:$0xff]  }
 0x141   :  { %1991 = vmatpush1.bf16.msra.mxu0 %v3430_v26  ;;  %3006 = vmatpush3.bf16.msra.mxu1 %v3523_v59  ;;  %v3474_v26 = vld [vmem:[%s4260_s3 + $0x124] ss:$8 sps:$4 sm:$0xff]   ;;  %v3526_v59 = vld [vmem:[%s4262_s5 + $0x70] sm:$0xff]  }
 0x142   :  { %1992 = vmatprep.subr.bf16.mxu0 %v3435_v27  ;;  %3007 = vmatprep.subr.bf16.mxu1 %v3524_v60  ;;  %v3472_v27 = vld [vmem:[%s4260_s3 + $0x120] ss:$8 sps:$4 sm:$0xff]   ;;  %v3527_v60 = vld [vmem:[%s4262_s5 + $0x30] sm:$0xff]  }
 0x145   :  { %1993 = vmatpush1.bf16.msra.mxu0 %v3433_v28  ;;  %3008 = vmatpush3.bf16.msra.mxu1 %v3525_v61  ;;  %v3477_v28 = vld [vmem:[%s4260_s3 + $0x134] ss:$8 sps:$4 sm:$0xff]  }
 0x146   :  { %1994 = vmatprep.subr.bf16.mxu0 %v3438_v29  ;;  %v3475_v29 = vld [vmem:[%s4260_s3 + $0x130] ss:$8 sps:$4 sm:$0xff]   ;;  %3009 = vmatprep.subr.bf16.mxu1 %v3526_v59 }
 0x147   :  { %v3528_v61 = vld [vmem:[%s4262_s5 + $0x78] sm:$0xff]  }
 0x149   :  { %1995 = vmatpush1.bf16.msra.mxu0 %v3436_v30  ;;  %v3480_v30 = vld [vmem:[%s4260_s3 + $0x144] ss:$8 sps:$4 sm:$0xff]   ;;  %3010 = vmatpush3.bf16.msra.mxu1 %v3527_v60 }
 0x14a   :  { %1996 = vmatprep.subr.bf16.mxu0 %v3441_v12  ;;  %v3478_v12 = vld [vmem:[%s4260_s3 + $0x140] ss:$8 sps:$4 sm:$0xff]   ;;  %3011 = vmatprep.subr.bf16.mxu1 %v3528_v61 }
 0x14d   :  { %1997 = vmatpush1.bf16.msra.mxu0 %v3439_v31  ;;  %v3483_v31 = vld [vmem:[%s4260_s3 + $0x154] ss:$8 sps:$4 sm:$0xff]  }
 0x14e   :  { %1998 = vmatprep.subr.bf16.mxu0 %v3444_v32  ;;  %v3481_v32 = vld [vmem:[%s4260_s3 + $0x150] ss:$8 sps:$4 sm:$0xff]  }
 0x151   :  { %1999 = vmatpush1.bf16.msra.mxu0 %v3442_v33  ;;  %v3486_v33 = vld [vmem:[%s4260_s3 + $0x164] ss:$8 sps:$4 sm:$0xff]  }
 0x152   :  { %2000 = vmatprep.subr.bf16.mxu0 %v3447_v34  ;;  %v3484_v34 = vld [vmem:[%s4260_s3 + $0x160] ss:$8 sps:$4 sm:$0xff]  }
 0x155   :  { %2001 = vmatpush1.bf16.msra.mxu0 %v3445_v35  ;;  %v3489_v35 = vld [vmem:[%s4260_s3 + $0x174] ss:$8 sps:$4 sm:$0xff]  }
 0x156   :  { %2002 = vmatprep.subr.bf16.mxu0 %v3450_v36  ;;  %v3487_v36 = vld [vmem:[%s4260_s3 + $0x170] ss:$8 sps:$4 sm:$0xff]  }
 0x159   :  { %2003 = vmatpush1.bf16.msra.mxu0 %v3448_v37  ;;  %v3492_v37 = vld [vmem:[%s4260_s3 + $0x184] ss:$8 sps:$4 sm:$0xff]  }
 0x15a   :  { %2004 = vmatprep.subr.bf16.mxu0 %v3453_v38  ;;  %v3490_v38 = vld [vmem:[%s4260_s3 + $0x180] ss:$8 sps:$4 sm:$0xff]  }
 0x15d   :  { %2005 = vmatpush1.bf16.msra.mxu0 %v3451_v39  ;;  %v3495_v39 = vld [vmem:[%s4260_s3 + $0x194] ss:$8 sps:$4 sm:$0xff]  }
 0x15e   :  { %2006 = vmatprep.subr.bf16.mxu0 %v3456_v40  ;;  %v3493_v40 = vld [vmem:[%s4260_s3 + $0x190] ss:$8 sps:$4 sm:$0xff]  }
 0x161   :  { %2007 = vmatpush1.bf16.msra.mxu0 %v3454_v41  ;;  %v3498_v41 = vld [vmem:[%s4260_s3 + $0x1a4] ss:$8 sps:$4 sm:$0xff]  }
 0x162   :  { %2008 = vmatprep.subr.bf16.mxu0 %v3459_v43  ;;  %v3496_v43 = vld [vmem:[%s4260_s3 + $0x1a0] ss:$8 sps:$4 sm:$0xff]  }
 0x165   :  { %2009 = vmatpush1.bf16.msra.mxu0 %v3457_v44  ;;  %v3501_v44 = vld [vmem:[%s4260_s3 + $0x1b4] ss:$8 sps:$4 sm:$0xff]  }
 0x166   :  { %2010 = vmatprep.subr.bf16.mxu0 %v3462_v45  ;;  %v3499_v45 = vld [vmem:[%s4260_s3 + $0x1b0] ss:$8 sps:$4 sm:$0xff]  }
 0x169   :  { %2011 = vmatpush1.bf16.msra.mxu0 %v3460_v46  ;;  %v3504_v46 = vld [vmem:[%s4260_s3 + $0x1c4] ss:$8 sps:$4 sm:$0xff]  }
 0x16a   :  { %2012 = vmatprep.subr.bf16.mxu0 %v3465_v47  ;;  %v3502_v47 = vld [vmem:[%s4260_s3 + $0x1c0] ss:$8 sps:$4 sm:$0xff]  }
 0x16d   :  { %2013 = vmatpush1.bf16.msra.mxu0 %v3463_v48  ;;  %v329_v48 = vsub.s32 2, %v3861_v42  ;;  %v3533_v42 = vld [vmem:[%s4264_s7 + $0x8] sm:$0xff]  }
 0x16e   :  { %2023 = vmatprep.subr.bf16.mxu0 %v3468_v49  ;;  %v3507_v49 = vld [vmem:[%s4260_s3 + $0x1d4] ss:$8 sps:$4 sm:$0xff]  }
 0x16f   :  { %v330_v51 = vrot.slane %v4021_v63, %v329_v48  ;;  %v3529_v63 = vld [vmem:[%s4262_s5 + $0x38] sm:$0xff]  }
 0x170   :  { %3012 = vmatpush3.bf16.msra.mxu1 %v3529_v63 }
 0x171   :  { %3019 = vmatprep.subr.bf16.mxu1 %v3530_v1 }
 0x203   :  { %v1448_v5 = vpop.f32.mrb[0].mxu0  ;;  %v4032_v6 = vpop.f32.mrb[0].mxu1 }
 0x204   :  { %v3092_v7 = vadd.f32 %v1448_v5, %v322_v2  ;;  %v1450_v8 = vpop.f32.mrb[1].mxu0  ;;  %v1573_v9 = vpop.f32.mrb[1].mxu1  ;;  %v3094_v54 = vadd.f32 %v4032_v6, %v330_v51  ;;  %v1650_v2 = vld [vmem:[#allocation4] sm:$0x3] }
 0x205   :  { %v3093_v10 = vadd.f32 %v1450_v8, %v326_v3  ;;  %v3095_v11 = vadd.f32 %v1573_v9, %v334_v4  ;;  %v1452_v13 = vpop.f32.mrb[2].mxu0  ;;  %v1575_v14 = vpop.f32.mrb[2].mxu1  ;;  %v1655_v3 = vrot.slane %v1650_v2, %v321_v62  ;;  %v1659_v4 = vrot.slane %v1650_v2, %v325_v0  ;;  %v3532_v62 = vld [vmem:[%s4264_s7 + $0x48] sm:$0xff]   ;;  %v3534_v0 = vld [vmem:[%s4264_s7 + $0x50] sm:$0xff]   ;;  %v3554_v2 = vld [vmem:[%s4270_s13] sm:$0xff]  }
 0x206   :  { %v1578_v15 = vmax.f32 %v3092_v7, 0.0  ;;  %v1453_v16 = vpop.f32.mrb[3].mxu0  ;;  %v1576_v17 = vpop.f32.mrb[3].mxu1  ;;  %v1580_v57 = vmax.f32 %v3094_v54, 0.0  ;;  %v3551_v54 = vld [vmem:[%s4268_s11 + $0x8] sm:$0xff]  }
 0x207   :  { %v1579_v18 = vmax.f32 %v3093_v10, 0.0  ;;  %v1581_v20 = vmax.f32 %v3095_v11, 0.0  ;;  %v3535_v17 = vld [vmem:[%s4264_s7 + $0x10] sm:$0xff]  }
 0x208   :  { %v1582_v23 = vpack.c.bf16 %v1578_v15, %v1578_v15  ;;  %v1584_v58 = vpack.c.bf16 %v1580_v57, %v1580_v57  ;;  %v3531_v15 = vld [vmem:[%s4264_s7] sm:$0xff]  }
 0x209   :  { %v1583_v21 = vpack.c.bf16 %v1579_v18, %v1579_v18  ;;  %v1585_v24 = vpack.c.bf16 %v1581_v20, %v1581_v20  ;;  %v3536_v18 = vld [vmem:[%s4264_s7 + $0x58] sm:$0xff]   ;;  %v2979_v57 = vld [vmem:[#allocation7] ss:$0 sm:$0xff] }
 0x20a   :  { %v3537_v20 = vld [vmem:[%s4264_s7 + $0x18] sm:$0xff]  }
 0x20b   :  { %2014 = vmatprep.mubr.bf16.mxu0 %v1583_v21  ;;  %v3538_v21 = vld [vmem:[%s4264_s7 + $0x60] sm:$0xff]  }
 0x20c   :  { %2015 = vmatmul.mubr.bf16.vlgmr.msra.gmra.mrb[4].mxu0 %v1582_v23  ;;  %v3540_v23 = vld [vmem:[%s4264_s7 + $0x68] sm:$0xff]  }
 0x20d   :  { %2024 = vmatpush1.bf16.msra.mxu0 %v3466_v22  ;;  %2055 = vmatprep.mubr.bf16.mxu0 %v1585_v24  ;;  %v3539_v22 = vld [vmem:[%s4264_s7 + $0x20] sm:$0xff]   ;;  %v3542_v24 = vld [vmem:[%s4264_s7 + $0x70] sm:$0xff]  }
 0x20e   :  { %2025 = vmatprep.subr.bf16.mxu0 %v3471_v19  ;;  %v3541_v19 = vld [vmem:[%s4264_s7 + $0x28] sm:$0xff]  }
 0x211   :  { %2026 = vmatpush1.bf16.msra.mxu0 %v3469_v25  ;;  %v3543_v25 = vld [vmem:[%s4264_s7 + $0x30] sm:$0xff]  }
 0x212   :  { %2027 = vmatprep.subr.bf16.mxu0 %v3474_v26  ;;  %v3544_v26 = vld [vmem:[%s4264_s7 + $0x78] sm:$0xff]  }
 0x215   :  { %2028 = vmatpush1.bf16.msra.mxu0 %v3472_v27  ;;  %v3545_v27 = vld [vmem:[%s4264_s7 + $0x38] sm:$0xff]  }
 0x216   :  { %2029 = vmatprep.subr.bf16.mxu0 %v3477_v28  ;;  %v3707_v28 = vmov 0.0  }
 0x219   :  { %2030 = vmatpush1.bf16.msra.mxu0 %v3475_v29 }
 0x21a   :  { %2031 = vmatprep.subr.bf16.mxu0 %v3480_v30  ;;  %v2945_v30 = vld [vmem:[%s4263_s6] ss:$0 sm:$0xff] }
 0x21d   :  { %2032 = vmatpush1.bf16.msra.mxu0 %v3478_v12 }
 0x21e   :  { %2033 = vmatprep.subr.bf16.mxu0 %v3483_v31 }
 0x221   :  { %2034 = vmatpush1.bf16.msra.mxu0 %v3481_v32 }
 0x222   :  { %2035 = vmatprep.subr.bf16.mxu0 %v3486_v33 }
 0x225   :  { %2036 = vmatpush1.bf16.msra.mxu0 %v3484_v34 }
 0x226   :  { %2037 = vmatprep.subr.bf16.mxu0 %v3489_v35 }
 0x229   :  { %2038 = vmatpush1.bf16.msra.mxu0 %v3487_v36 }
 0x22a   :  { %2039 = vmatprep.subr.bf16.mxu0 %v3492_v37 }
 0x22d   :  { %2040 = vmatpush1.bf16.msra.mxu0 %v3490_v38  ;;  %v3546_v38 = vld [vmem:[%s4266_s9] sm:$0xff]  }
 0x22e   :  { %2041 = vmatprep.subr.bf16.mxu0 %v3495_v39 }
 0x231   :  { %2042 = vmatpush1.bf16.msra.mxu0 %v3493_v40  ;;  %v3547_v40 = vld [vmem:[%s4266_s9 + $0x8] sm:$0xff]  }
 0x232   :  { %2043 = vmatprep.subr.bf16.mxu0 %v3498_v41  ;;  %v3548_v41 = vld [vmem:[%s4266_s9 + $0x10] sm:$0xff]  }
 0x235   :  { %2044 = vmatpush1.bf16.msra.mxu0 %v3496_v43  ;;  %v3549_v43 = vld [vmem:[%s4266_s9 + $0x18] sm:$0xff]  }
 0x236   :  { %2045 = vmatprep.subr.bf16.mxu0 %v3501_v44 }
 0x239   :  { %2046 = vmatpush1.bf16.msra.mxu0 %v3499_v45  ;;  %v2962_v45 = vld [vmem:[#allocation6] ss:$0 sm:$0xff] }
 0x23a   :  { %2047 = vmatprep.subr.bf16.mxu0 %v3504_v46 }
 0x23d   :  { %2048 = vmatpush1.bf16.msra.mxu0 %v3502_v47 }
 0x23e   :  { %2049 = vmatprep.subr.bf16.mxu0 %v3507_v49 }
 0x241   :  { %2050 = vmatpush1.bf16.msra.mxu0 %v3505_v50 }
 0x242   :  { %2051 = vmatprep.subr.bf16.mxu0 %v3510_v52  ;;  %v3550_v52 = vld [vmem:[%s4268_s11] sm:$0xff]  }
 0x245   :  { %2052 = vmatpush1.bf16.msra.mxu0 %v3508_v53 }
 0x246   :  { %2053 = vmatprep.subr.bf16.mxu0 %v3513_v55  ;;  %v3552_v55 = vld [vmem:[%s4268_s11 + $0x10] sm:$0xff]  }
 0x249   :  { %2054 = vmatpush1.bf16.msra.mxu0 %v3511_v56  ;;  %v3553_v56 = vld [vmem:[%s4268_s11 + $0x18] sm:$0xff]  }
 0x24c   :  { %2056 = vmatmul.mubr.bf16.vlgmr.msra.gmra.mrb[4].mxu0 %v1584_v58 }
 0x31f   :  { %v2057_v5 = vpop.f32.mrb[4].mxu0 }
 0x320   :  { %v3096_v6 = vadd.f32 %v2057_v5, %v1655_v3  ;;  %v2059_v7 = vpop.f32.mrb[5].mxu0  ;;  %v3556_v5 = vld [vmem:[%s4270_s13 + $0x10] sm:$0xff]  }
 0x321   :  { %v3097_v8 = vadd.f32 %v2059_v7, %v1659_v4  ;;  %v2061_v9 = vpop.f32.mrb[6].mxu0  ;;  %v3555_v4 = vld [vmem:[%s4270_s13 + $0x8] sm:$0xff]   ;;  %v2985_v7 = vld [vmem:[#allocation9] ss:$0 sm:$0xff] }
 0x322   :  { %v2064_v10 = vmax.f32 %v3096_v6, 0.0  ;;  %v2062_v11 = vpop.f32.mrb[7].mxu0  ;;  %v3557_v6 = vld [vmem:[%s4270_s13 + $0x18] sm:$0xff]  }
 0x323   :  { %v2065_v13 = vmax.f32 %v3097_v8, 0.0 }
 0x324   :  { %v2066_v16 = vpack.c.bf16 %v2064_v10, %v2064_v10 }
 0x325   :  { %v2067_v14 = vpack.c.bf16 %v2065_v13, %v2065_v13 }
 0x327   :  { %2235 = vmatprep.mubr.bf16.mxu1 %v2067_v14 }
 0x328   :  { %2236 = vmatmul.mubr.bf16.vlgmr.msra.gmra.mrb[4].mxu1 %v2066_v16  ;;  %v2991_v16 = vld [vmem:[#allocation10] ss:$0 sm:$0xff] }
 0x329   :  { %3020 = vmatpush3.bf16.msra.mxu1 %v3531_v15 }
 0x32a   :  { %3021 = vmatprep.subr.bf16.mxu1 %v3532_v62 }
 0x32d   :  { %3022 = vmatpush3.bf16.msra.mxu1 %v3533_v42 }
 0x32e   :  { %3023 = vmatprep.subr.bf16.mxu1 %v3534_v0 }
 0x331   :  { %3024 = vmatpush3.bf16.msra.mxu1 %v3535_v17 }
 0x332   :  { %3025 = vmatprep.subr.bf16.mxu1 %v3536_v18 }
 0x335   :  { %3026 = vmatpush3.bf16.msra.mxu1 %v3537_v20 }
 0x336   :  { %3027 = vmatprep.subr.bf16.mxu1 %v3538_v21 }
 0x339   :  { %3028 = vmatpush3.bf16.msra.mxu1 %v3539_v22 }
 0x33a   :  { %3029 = vmatprep.subr.bf16.mxu1 %v3540_v23 }
 0x33d   :  { %3030 = vmatpush3.bf16.msra.mxu1 %v3541_v19 }
 0x33e   :  { %3031 = vmatprep.subr.bf16.mxu1 %v3542_v24 }
 0x341   :  { %3032 = vmatpush3.bf16.msra.mxu1 %v3543_v25 }
 0x342   :  { %3033 = vmatprep.subr.bf16.mxu1 %v3544_v26 }
 0x345   :  { %3034 = vmatpush3.bf16.msra.mxu1 %v3545_v27 }
 0x346   :  { %3056 = vmatprep.subr.bf16.mxu1 %v3707_v28 }
 0x3fb   :  { %v3013_v29 = vpop.f32.mrb[4].mxu1 }
 0x3fc   :  { %v3014_v12 = vpop.f32.mrb[5].mxu1 }
 0x3fd   :  { %v3015_v31 = vadd.f32 %v3014_v12, %v3013_v29  ;;  %v3016_v32 = vpop.f32.mrb[6].mxu1 }
 0x3fe   :  { %v3017_v33 = vpop.f32.mrb[7].mxu1 }
 0x3ff   :  { %v2238_v34 = vadd.f32 %v3015_v31, %v2945_v30 }
 0x401   :  { %v2243_v35 = vmax.f32 %v2238_v34, 0.0 }
 0x403   :  { %v2245_v36 = vrot.slane %v2243_v35, 2  ;;  %v2247_v39 = vpack.c.bf16 %v2243_v35, %v2243_v35 }
 0x405   :  { %v2248_v37 = vpack.c.bf16 %v2245_v36, %v2245_v36 }
 0x407   :  { %2416 = vmatprep.mubr.bf16.mxu1 %v2248_v37 }
 0x408   :  { %2417 = vmatmul.mubr.bf16.vlgmr.msra.gmra.mrb[8].mxu1 %v2247_v39 }
 0x409   :  { %3057 = vmatpush3.bf16.msra.mxu1 %v3546_v38  ;;  %3064 = vmatprep.mubr.msk.bf16.mxu1 %vm3708_vm0, %v3707_v28 }
 0x40a   :  { %3058 = vmatprep.subr.bf16.mxu1 %v3707_v28 }
 0x40d   :  { %3059 = vmatpush3.bf16.msra.mxu1 %v3547_v40 }
 0x40e   :  { %3060 = vmatprep.subr.bf16.mxu1 %v3707_v28 }
 0x411   :  { %3061 = vmatpush3.bf16.msra.mxu1 %v3548_v41 }
 0x412   :  { %3062 = vmatprep.subr.bf16.mxu1 %v3707_v28 }
 0x415   :  { %3063 = vmatpush3.bf16.msra.mxu1 %v3549_v43 }
 0x416   :  { %3068 = vmatprep.subr.bf16.mxu1 %v3707_v28 }
 0x4db   :  { %v3035_v44 = vpop.f32.mrb[8].mxu1 }
 0x4dc   :  { %v3036_v46 = vpop.f32.mrb[9].mxu1 }
 0x4dd   :  { %v3037_v47 = vadd.f32 %v3036_v46, %v3035_v44  ;;  %v3038_v48 = vpop.f32.mrb[10].mxu1 }
 0x4de   :  { %v3039_v49 = vpop.f32.mrb[11].mxu1 }
 0x4df   :  { %v2419_v50 = vadd.f32 %v3037_v47, %v2962_v45 }
 0x4e1   :  { %v2424_v51 = vmax.f32 %v2419_v50, 0.0 }
 0x4e3   :  { %v2425_v53 = vpack.c.bf16 %v2424_v51, %v2424_v51 }
 0x4e5   :  { %3065 = vmatmul.mubr.msk.bf16.vlgmr.msra.gmra.mrb[12].mxu1 %vm2465_vm1, %v2425_v53 }
 0x4e6   :  { %3069 = vmatpush3.bf16.msra.mxu1 %v3550_v52  ;;  %3076 = vmatprep.mubr.msk.bf16.mxu1 %vm3708_vm0, %v3707_v28 }
 0x4e7   :  { %3070 = vmatprep.subr.bf16.mxu1 %v3707_v28 }
 0x4ea   :  { %3071 = vmatpush3.bf16.msra.mxu1 %v3551_v54 }
 0x4eb   :  { %3072 = vmatprep.subr.bf16.mxu1 %v3707_v28 }
 0x4ee   :  { %3073 = vmatpush3.bf16.msra.mxu1 %v3552_v55 }
 0x4ef   :  { %3074 = vmatprep.subr.bf16.mxu1 %v3707_v28 }
 0x4f2   :  { %3075 = vmatpush3.bf16.msra.mxu1 %v3553_v56 }
 0x4f3   :  { %3080 = vmatprep.subr.bf16.mxu1 %v3707_v28 }
 0x5b8   :  { %v2503_v58 = vpop.f32.mrb[12].mxu1 }
 0x5b9   :  { %v2504_v59 = vadd.f32 %v2979_v57, %v2503_v58  ;;  %v3066_v60 = vpop.f32.mrb[13].mxu1 }
 0x5ba   :  { %v2506_v61 = vpop.f32.mrb[14].mxu1 }
 0x5bb   :  { %v2509_v63 = vmax.f32 %v2504_v59, 0.0  ;;  %v3067_v1 = vpop.f32.mrb[15].mxu1 }
 0x5bd   :  { %v2510_v3 = vpack.c.bf16 %v2509_v63, %v2509_v63 }
 0x5bf   :  { %3077 = vmatmul.mubr.msk.bf16.vlgmr.msra.gmra.mrb[16].mxu1 %vm2465_vm1, %v2510_v3 }
 0x5c0   :  { %3081 = vmatpush3.bf16.msra.mxu1 %v3554_v2  ;;  %3088 = vmatprep.mubr.msk.bf16.mxu1 %vm3708_vm0, %v3707_v28 }
 0x5c1   :  { %3082 = vmatprep.subr.bf16.mxu1 %v3707_v28 }
 0x5c4   :  { %3083 = vmatpush3.bf16.msra.mxu1 %v3555_v4 }
 0x5c5   :  { %3084 = vmatprep.subr.bf16.mxu1 %v3707_v28 }
 0x5c8   :  { %3085 = vmatpush3.bf16.msra.mxu1 %v3556_v5 }
 0x5c9   :  { %3086 = vmatprep.subr.bf16.mxu1 %v3707_v28 }
 0x5cc   :  { %3087 = vmatpush3.bf16.msra.mxu1 %v3557_v6 }
 0x692   :  { %v2587_v8 = vpop.f32.mrb[16].mxu1 }
 0x693   :  { %v2588_v9 = vadd.f32 %v2985_v7, %v2587_v8  ;;  %v3078_v10 = vpop.f32.mrb[17].mxu1 }
 0x694   :  { %v2590_v11 = vpop.f32.mrb[18].mxu1 }
 0x695   :  { %v2593_v13 = vmax.f32 %v2588_v9, 0.0  ;;  %v3079_v14 = vpop.f32.mrb[19].mxu1 }
 0x697   :  { %v2594_v15 = vpack.c.bf16 %v2593_v13, %v2593_v13 }
 0x699   :  { %3089 = vmatmul.mubr.msk.bf16.vlgmr.msra.gmra.mrb[20].mxu1 %vm2465_vm1, %v2594_v15 }
 0x76c   :  { %v2671_v62 = vpop.f32.mrb[20].mxu1 }
 0x76d   :  { %v2672_v42 = vadd.f32 %v2991_v16, %v2671_v62  ;;  %v3090_v0 = vpop.f32.mrb[21].mxu1 }
 0x76e   :  { %v2674_v17 = vpop.f32.mrb[22].mxu1 }
 0x76f   :  { %v2677_v18 = vmul.f32 0.01, %v2672_v42  ;;  %v3091_v20 = vpop.f32.mrb[23].mxu1 }
 0x771   :  { %2679 = vst.msk [vmem:[%s4272_s15] sm:$0x3] %vm2678_vm2, %v2677_v18 }
 0x772   :  { %2684 = vsyncpa [#allocation3], 1 }
 0x773   :  { %2685 = vsyncpa [#allocation5], 1 }
 0x774   :  { %2686 = vsyncpa [#allocation8], 1 }
 0x775   :  { %2687 = vsyncpa [#allocation11], 1 }

</bundles_post_ra>
